<compile_context>
chip_gen: v7x
topology: tpu7x:2x2x1
jax: 0.10.0
libtpu: 0.0.40
codegen_flags: <defaults>
</compile_context>

<pallas_src>
import jax
import jax.numpy as jnp
from jax.experimental import pallas as pl
from jax.experimental.pallas import tpu as pltpu


def pheno_kernel(gh1_ref, h1_ref, gh2_ref, h2_ref, phen_ref,
                 w_ref, kp_ref, w1a_ref, lin_ref, b2_ref, out_ref):
    f32 = jnp.float32
    gh1 = gh1_ref[...].astype(f32)                 # (T, H)
    h1 = h1_ref[...].astype(f32)
    gh2 = gh2_ref[...].astype(f32)
    h2 = h2_ref[...].astype(f32)

    def contract(slab, m):
        # (T, H) @ (H, K) on the MXU, f32 accumulate; slab consumed directly.
        return jnp.dot(slab, w_ref[m], preferred_element_type=f32)

    # x3[b,k] = sum_j hpar[k,j]^2 * a1[b,k,j] * a2[b,k,j], with
    #   a1 = s*gh1 + s*e_gen*h1 + c  (a2 analogous), expanded so the h_len
    # reduction becomes five MXU contractions against coefficient-scaled
    # hpar^2 weights (precomputed in the wrapper) plus a per-k constant.
    x3 = contract(gh1 * gh2, 0)
    x3 = x3 + contract(gh1 * h2 + h1 * gh2, 1)
    x3 = x3 + contract(h1 * h2, 2)
    x3 = x3 + contract(gh1 + gh2, 3)
    x3 = x3 + contract(h1 + h2, 4)
    x3 = x3 + kp_ref[0:1, :]                       # c^2 * sum_j hpar^2
    # Guard tiny negatives from cancellation in the expanded form (the
    # factored reference form is identical in exact arithmetic).
    x3 = jnp.maximum(x3, 0.0)

    out = jnp.sqrt(x3) * kp_ref[1:2, :] + kp_ref[2:3, :]         # (T, K)

    # linear1 over cat([out, phenopy_res]); phenopy column as rank-1 update.
    phen = phen_ref[...].astype(f32)                              # (T, 1)
    h = (jnp.dot(out, w1a_ref[...], preferred_element_type=f32)
         + phen * lin_ref[0:1, :] + lin_ref[1:2, :])              # (T, 2K)
    h = jnp.where(h > 0, h, 0.1 * h)                              # LeakyReLU(0.1)

    # linear2 (out_features=1) off the MXU: VPU multiply + lane reduce.
    y = jnp.sum(h * lin_ref[2:3, :], axis=1, keepdims=True) + b2_ref[0, 0]
    out_ref[...] = jax.nn.sigmoid(y).astype(out_ref.dtype)


def _round_up(x, m):
    return ((x + m - 1) // m) * m


def _cdiv(a, b):
    return (a + b - 1) // b


def pheno_connect_pp_forward(gh1, h1, gh2, h2, phenopy_res, params, g_len,
                             *, max_tile_b=2048):
    B, H = gh1.shape
    K = params["out_scale"].shape[1]
    f32 = jnp.float32

    # Batch tile: big enough to amortise per-step overhead, small enough that
    # double-buffered activation tiles + temporaries stay well under the 40MiB
    # VMEM limit requested below (fits v7x's 64MiB physical VMEM per TC).
    tile_b = min(max_tile_b, _round_up(B, 128))
    num_tiles = _cdiv(B, tile_b)
    if num_tiles == 1 and B > 128:
        # Prefer >=2 grid steps so ("parallel",) can shard across v7x's 2 TCs.
        tile_b = _round_up(_cdiv(B, 2), 128)
        num_tiles = _cdiv(B, tile_b)
    grid = (num_tiles,)

    # ---- parameter-only math, hoisted out of the per-step kernel body ------
    hpar = jnp.reshape(params["hpo_par"], (K, H)).astype(f32)           # (K,H)
    hsq = hpar * hpar
    s = jnp.reshape(params["genes_hpo_scale"], (K, 1)).astype(f32)
    e_gen = jnp.exp(jnp.reshape(params["gen_bias"], (K, 1)).astype(f32))
    se = s * e_gen
    c = (float(g_len) * s
         * jnp.exp(jnp.reshape(params["hpo_bias"], (K, 1)).astype(f32))
         * (1.0 + e_gen))
    # a1*a2 = s^2 gh1 gh2 + s*se (gh1 h2 + h1 gh2) + se^2 h1 h2
    #       + s*c (gh1 + gh2) + se*c (h1 + h2) + c^2
    coefs = jnp.stack([s * s, s * se, se * se, s * c, se * c], axis=0)  # (5,K,1)
    w_slabs = jnp.transpose(coefs * hsq[None, :, :], (0, 2, 1))         # (5,H,K)
    c2r = (c * c) * jnp.sum(hsq, axis=1, keepdims=True)                 # (K,1)

    kparams = jnp.concatenate(
        [c2r.T,
         jnp.reshape(params["out_scale"], (1, K)).astype(f32),
         jnp.reshape(params["bias"], (1, K)).astype(f32)], axis=0)      # (3,K)

    w1 = params["w1"].astype(f32)                    # (2K, K+1) torch layout
    w1a_t = w1[:, :K].T                              # (K, 2K)
    lin_rows = jnp.stack(
        [w1[:, K],                                   # phenopy column as a row
         jnp.reshape(params["b1"], (2 * K,)).astype(f32),
         jnp.reshape(params["w2"], (2 * K,)).astype(f32)], axis=0)      # (3,2K)
    b2 = jnp.reshape(params["b2"], (1, 1)).astype(f32)

    act_spec = pl.BlockSpec((tile_b, H), lambda i: (i, 0))
    col_spec = pl.BlockSpec((tile_b, 1), lambda i: (i, 0))

    def resident(shape):
        return pl.BlockSpec(shape, lambda i: (0,) * len(shape))

    itemsize = jnp.dtype(gh1.dtype).itemsize
    flops = B * (10 * H * K + 4 * K * K + 8 * H + 24 * K)
    transcendentals = B * (K + 1)
    bytes_accessed = (4 * B * H * itemsize + 8 * B
                      + 4 * (5 * H * K + 3 * K + 2 * K * K + 6 * K + 1))

    out = pl.pallas_call(
        pheno_kernel,
        out_shape=jax.ShapeDtypeStruct((B, 1), f32),
        grid=grid,
        in_specs=[act_spec, act_spec, act_spec, act_spec, col_spec,
                  resident((5, H, K)), resident((3, K)),
                  resident((K, 2 * K)), resident((3, 2 * K)),
                  pl.BlockSpec(memory_space=pltpu.MemorySpace.SMEM)],
        out_specs=col_spec,
        compiler_params=pltpu.CompilerParams(
            dimension_semantics=("parallel",),
            vmem_limit_bytes=40 * 1024 * 1024),
        cost_estimate=pl.CostEstimate(
            flops=flops, transcendentals=transcendentals,
            bytes_accessed=bytes_accessed),
    )(gh1, h1, gh2, h2, jnp.reshape(phenopy_res, (B, 1)),
      w_slabs, kparams, w1a_t, lin_rows, b2)

    return out                                                          # (B, 1)


def init_params(key, h_len, hidden_len):
    ks = jax.random.split(key, 10)
    f32 = jnp.float32
    return {
        # PyTorch parameter shapes
        "hpo_par": 0.1 + 0.02 * jax.random.normal(ks[0], (hidden_len, 1, h_len), f32),
        "out_scale": 0.001 + 0.0005 * jax.random.normal(ks[1], (1, hidden_len), f32),
        "bias": -50.0 + 10.0 * jax.random.normal(ks[2], (1, hidden_len), f32),
        "genes_hpo_scale": 0.5 + 0.1 * jax.random.normal(ks[3], (1, hidden_len, 1), f32),
        "hpo_bias": -1.0 + 0.2 * jax.random.normal(ks[4], (1, hidden_len, 1), f32),
        "gen_bias": -3.0 + 1.0 * jax.random.normal(ks[5], (1, hidden_len, 1), f32),
        # nn.Linear weights in PyTorch (out_features, in_features) orientation.
        "w1": 0.05 * jax.random.normal(ks[6], (2 * hidden_len, hidden_len + 1), f32),
        "b1": 0.01 * jax.random.normal(ks[7], (2 * hidden_len,), f32),
        "w2": 0.05 * jax.random.normal(ks[8], (1, 2 * hidden_len), f32),
        "b2": 0.01 * jax.random.normal(ks[9], (1,), f32),
    }


def reference_forward(gh1, h1, gh2, h2, phen, params, g_len):
    """Pure-JAX mirror of the PyTorch forward (factored form)."""
    K = params["out_scale"].shape[1]
    s = jnp.reshape(params["genes_hpo_scale"], (1, K, 1))
    gb = jnp.reshape(params["gen_bias"], (1, K, 1))
    hb = jnp.reshape(params["hpo_bias"], (1, K, 1))
    hpar = jnp.reshape(params["hpo_par"], (1, K, -1))
    c = g_len * s * jnp.exp(hb) * (1.0 + jnp.exp(gb))
    a1 = gh1[:, None, :] * s + h1[:, None, :] * s * jnp.exp(gb) + c
    a2 = gh2[:, None, :] * s + h2[:, None, :] * s * jnp.exp(gb) + c
    x3 = jnp.sum((a1 * hpar) * (a2 * hpar), axis=-1)              # (B, K)
    out = jnp.sqrt(x3) * params["out_scale"] + params["bias"]
    out = jnp.concatenate([out, phen], axis=1)                    # (B, K+1)
    h = out @ params["w1"].T + params["b1"][None, :]
    h = jnp.where(h > 0, h, 0.1 * h)
    y = h @ params["w2"].T + params["b2"][None, :]
    return jax.nn.sigmoid(y)


if __name__ == "__main__":
    g_len = 16
    h_len = 128
    hidden_len = 32

    key = jax.random.PRNGKey(0)
    kp = jax.random.fold_in(key, 123)
    params = init_params(kp, h_len, hidden_len)

    # B=2: single masked edge block.  B=300: multi-step ("parallel") grid with
    # a ragged final tile.
    for B in (2, 300):
        ks = jax.random.split(jax.random.fold_in(key, B), 5)
        gh1 = jax.random.uniform(ks[0], (B, h_len), jnp.float32)
        h1 = jax.random.uniform(ks[1], (B, h_len), jnp.float32)
        gh2 = jax.random.uniform(ks[2], (B, h_len), jnp.float32)
        h2 = jax.random.uniform(ks[3], (B, h_len), jnp.float32)
        phenopy_res = jax.random.uniform(ks[4], (B, 1), jnp.float32)

        out = pheno_connect_pp_forward(gh1, h1, gh2, h2, phenopy_res,
                                       params, g_len)
        out = jax.block_until_ready(out)
        assert out.shape == (B, 1)

        ref = reference_forward(gh1, h1, gh2, h2, phenopy_res, params, g_len)
        assert jnp.allclose(out, ref, atol=1e-3, rtol=1e-2), (B, out, ref)

    print("KERNEL_OK")
</pallas_src>

<mosaic_0001>
module attributes {stable_mosaic.version = 11 : i64} {
  func.func @pheno_kernel(%arg0: i32, %arg1: memref<128x128xf32, #tpu.memory_space<vmem>>, %arg2: memref<128x128xf32, #tpu.memory_space<vmem>>, %arg3: memref<128x128xf32, #tpu.memory_space<vmem>>, %arg4: memref<128x128xf32, #tpu.memory_space<vmem>>, %arg5: memref<128x1xf32, #tpu.memory_space<vmem>>, %arg6: memref<5x128x32xf32, #tpu.memory_space<vmem>>, %arg7: memref<3x32xf32, #tpu.memory_space<vmem>>, %arg8: memref<32x64xf32, #tpu.memory_space<vmem>>, %arg9: memref<3x64xf32, #tpu.memory_space<vmem>>, %arg10: memref<1x1xf32, #tpu.memory_space<smem>>, %arg11: memref<128x1xf32, #tpu.memory_space<vmem>>) attributes {dimension_semantics = [#tpu.dimension_semantics<parallel>], iteration_bounds = array<i64: 1>, scalar_prefetch = 0 : i64, scratch_operands = 0 : i64, tpu.core_type = #tpu.core_type<tc>, window_params = [{transform_indices = @transform_0, window_bounds = array<i64: 128, 128>}, {transform_indices = @transform_1, window_bounds = array<i64: 128, 128>}, {transform_indices = @transform_2, window_bounds = array<i64: 128, 128>}, {transform_indices = @transform_3, window_bounds = array<i64: 128, 128>}, {transform_indices = @transform_4, window_bounds = array<i64: 128, 1>}, {pipeline_mode = #tpu.pipeline_mode<synchronous>, transform_indices = @transform_5, window_bounds = array<i64: 5, 128, 32>}, {pipeline_mode = #tpu.pipeline_mode<synchronous>, transform_indices = @transform_6, window_bounds = array<i64: 3, 32>}, {pipeline_mode = #tpu.pipeline_mode<synchronous>, transform_indices = @transform_7, window_bounds = array<i64: 32, 64>}, {pipeline_mode = #tpu.pipeline_mode<synchronous>, transform_indices = @transform_8, window_bounds = array<i64: 3, 64>}, {transform_indices = @transform_9, window_bounds = array<i64: 1, 1>}, {transform_indices = @transform_10, window_bounds = array<i64: 128, 1>}]} {
    %c0 = arith.constant 0 : index
    %c0_0 = arith.constant 0 : index
    %0 = vector.load %arg1[%c0, %c0_0] : memref<128x128xf32, #tpu.memory_space<vmem>>, vector<128x128xf32>
    %c0_1 = arith.constant 0 : index
    %c0_2 = arith.constant 0 : index
    %1 = vector.load %arg2[%c0_1, %c0_2] : memref<128x128xf32, #tpu.memory_space<vmem>>, vector<128x128xf32>
    %c0_3 = arith.constant 0 : index
    %c0_4 = arith.constant 0 : index
    %2 = vector.load %arg3[%c0_3, %c0_4] : memref<128x128xf32, #tpu.memory_space<vmem>>, vector<128x128xf32>
    %c0_5 = arith.constant 0 : index
    %c0_6 = arith.constant 0 : index
    %3 = vector.load %arg4[%c0_5, %c0_6] : memref<128x128xf32, #tpu.memory_space<vmem>>, vector<128x128xf32>
    %4 = arith.mulf %0, %2 : vector<128x128xf32>
    %c0_7 = arith.constant 0 : index
    %c0_8 = arith.constant 0 : index
    %c0_9 = arith.constant 0 : index
    %5 = vector.load %arg6[%c0_7, %c0_8, %c0_9] : memref<5x128x32xf32, #tpu.memory_space<vmem>>, vector<1x128x32xf32>
    %6 = vector.shape_cast %5 : vector<1x128x32xf32> to vector<128x32xf32>
    %cst = arith.constant dense<0.000000e+00> : vector<128x32xf32>
    %7 = tpu.matmul %4, %6, %cst {dimension_numbers = #tpu.dot_dimension_numbers<[1], [0], [0], [1], [0, 0, 1, 1], [], []>} : vector<128x128xf32>, vector<128x32xf32>, vector<128x32xf32> -> vector<128x32xf32>
    %8 = arith.mulf %0, %3 : vector<128x128xf32>
    %9 = arith.mulf %1, %2 : vector<128x128xf32>
    %10 = arith.addf %8, %9 : vector<128x128xf32>
    %c1 = arith.constant 1 : index
    %c0_10 = arith.constant 0 : index
    %c0_11 = arith.constant 0 : index
    %11 = vector.load %arg6[%c1, %c0_10, %c0_11] : memref<5x128x32xf32, #tpu.memory_space<vmem>>, vector<1x128x32xf32>
    %12 = vector.shape_cast %11 : vector<1x128x32xf32> to vector<128x32xf32>
    %cst_12 = arith.constant dense<0.000000e+00> : vector<128x32xf32>
    %13 = tpu.matmul %10, %12, %cst_12 {dimension_numbers = #tpu.dot_dimension_numbers<[1], [0], [0], [1], [0, 0, 1, 1], [], []>} : vector<128x128xf32>, vector<128x32xf32>, vector<128x32xf32> -> vector<128x32xf32>
    %14 = arith.addf %7, %13 : vector<128x32xf32>
    %15 = arith.mulf %1, %3 : vector<128x128xf32>
    %c2 = arith.constant 2 : index
    %c0_13 = arith.constant 0 : index
    %c0_14 = arith.constant 0 : index
    %16 = vector.load %arg6[%c2, %c0_13, %c0_14] : memref<5x128x32xf32, #tpu.memory_space<vmem>>, vector<1x128x32xf32>
    %17 = vector.shape_cast %16 : vector<1x128x32xf32> to vector<128x32xf32>
    %cst_15 = arith.constant dense<0.000000e+00> : vector<128x32xf32>
    %18 = tpu.matmul %15, %17, %cst_15 {dimension_numbers = #tpu.dot_dimension_numbers<[1], [0], [0], [1], [0, 0, 1, 1], [], []>} : vector<128x128xf32>, vector<128x32xf32>, vector<128x32xf32> -> vector<128x32xf32>
    %19 = arith.addf %14, %18 : vector<128x32xf32>
    %20 = arith.addf %0, %2 : vector<128x128xf32>
    %c3 = arith.constant 3 : index
    %c0_16 = arith.constant 0 : index
    %c0_17 = arith.constant 0 : index
    %21 = vector.load %arg6[%c3, %c0_16, %c0_17] : memref<5x128x32xf32, #tpu.memory_space<vmem>>, vector<1x128x32xf32>
    %22 = vector.shape_cast %21 : vector<1x128x32xf32> to vector<128x32xf32>
    %cst_18 = arith.constant dense<0.000000e+00> : vector<128x32xf32>
    %23 = tpu.matmul %20, %22, %cst_18 {dimension_numbers = #tpu.dot_dimension_numbers<[1], [0], [0], [1], [0, 0, 1, 1], [], []>} : vector<128x128xf32>, vector<128x32xf32>, vector<128x32xf32> -> vector<128x32xf32>
    %24 = arith.addf %19, %23 : vector<128x32xf32>
    %25 = arith.addf %1, %3 : vector<128x128xf32>
    %c4 = arith.constant 4 : index
    %c0_19 = arith.constant 0 : index
    %c0_20 = arith.constant 0 : index
    %26 = vector.load %arg6[%c4, %c0_19, %c0_20] : memref<5x128x32xf32, #tpu.memory_space<vmem>>, vector<1x128x32xf32>
    %27 = vector.shape_cast %26 : vector<1x128x32xf32> to vector<128x32xf32>
    %cst_21 = arith.constant dense<0.000000e+00> : vector<128x32xf32>
    %28 = tpu.matmul %25, %27, %cst_21 {dimension_numbers = #tpu.dot_dimension_numbers<[1], [0], [0], [1], [0, 0, 1, 1], [], []>} : vector<128x128xf32>, vector<128x32xf32>, vector<128x32xf32> -> vector<128x32xf32>
    %29 = arith.addf %24, %28 : vector<128x32xf32>
    %c0_22 = arith.constant 0 : index
    %c0_23 = arith.constant 0 : index
    %30 = vector.load %arg7[%c0_22, %c0_23] : memref<3x32xf32, #tpu.memory_space<vmem>>, vector<1x32xf32>
    %31 = vector.broadcast %30 : vector<1x32xf32> to vector<128x32xf32>
    %32 = arith.addf %29, %31 : vector<128x32xf32>
    %cst_24 = arith.constant 0.000000e+00 : f32
    %33 = vector.broadcast %cst_24 : f32 to vector<128x32xf32>
    %34 = arith.maximumf %32, %33 : vector<128x32xf32>
    %35 = math.sqrt %34 : vector<128x32xf32>
    %c1_25 = arith.constant 1 : index
    %c0_26 = arith.constant 0 : index
    %36 = vector.load %arg7[%c1_25, %c0_26] : memref<3x32xf32, #tpu.memory_space<vmem>>, vector<1x32xf32>
    %37 = vector.broadcast %36 : vector<1x32xf32> to vector<128x32xf32>
    %38 = arith.mulf %35, %37 : vector<128x32xf32>
    %c2_27 = arith.constant 2 : index
    %c0_28 = arith.constant 0 : index
    %39 = vector.load %arg7[%c2_27, %c0_28] : memref<3x32xf32, #tpu.memory_space<vmem>>, vector<1x32xf32>
    %40 = vector.broadcast %39 : vector<1x32xf32> to vector<128x32xf32>
    %41 = arith.addf %38, %40 : vector<128x32xf32>
    %c0_29 = arith.constant 0 : index
    %c0_30 = arith.constant 0 : index
    %42 = vector.load %arg5[%c0_29, %c0_30] : memref<128x1xf32, #tpu.memory_space<vmem>>, vector<128x1xf32>
    %c0_31 = arith.constant 0 : index
    %c0_32 = arith.constant 0 : index
    %43 = vector.load %arg8[%c0_31, %c0_32] : memref<32x64xf32, #tpu.memory_space<vmem>>, vector<32x64xf32>
    %cst_33 = arith.constant dense<0.000000e+00> : vector<128x64xf32>
    %44 = tpu.matmul %41, %43, %cst_33 {dimension_numbers = #tpu.dot_dimension_numbers<[1], [0], [0], [1], [0, 0, 1, 1], [], []>} : vector<128x32xf32>, vector<32x64xf32>, vector<128x64xf32> -> vector<128x64xf32>
    %c0_34 = arith.constant 0 : index
    %c0_35 = arith.constant 0 : index
    %45 = vector.load %arg9[%c0_34, %c0_35] : memref<3x64xf32, #tpu.memory_space<vmem>>, vector<1x64xf32>
    %46 = vector.broadcast %42 : vector<128x1xf32> to vector<128x64xf32>
    %47 = vector.broadcast %45 : vector<1x64xf32> to vector<128x64xf32>
    %48 = arith.mulf %46, %47 : vector<128x64xf32>
    %49 = arith.addf %44, %48 : vector<128x64xf32>
    %c1_36 = arith.constant 1 : index
    %c0_37 = arith.constant 0 : index
    %50 = vector.load %arg9[%c1_36, %c0_37] : memref<3x64xf32, #tpu.memory_space<vmem>>, vector<1x64xf32>
    %51 = vector.broadcast %50 : vector<1x64xf32> to vector<128x64xf32>
    %52 = arith.addf %49, %51 : vector<128x64xf32>
    %cst_38 = arith.constant 0.000000e+00 : f32
    %53 = vector.broadcast %cst_38 : f32 to vector<128x64xf32>
    %54 = arith.cmpf ogt, %52, %53 : vector<128x64xf32>
    %cst_39 = arith.constant 1.000000e-01 : f32
    %55 = vector.broadcast %cst_39 : f32 to vector<128x64xf32>
    %56 = arith.mulf %55, %52 : vector<128x64xf32>
    %57 = arith.select %54, %52, %56 : vector<128x64xi1>, vector<128x64xf32>
    %c2_40 = arith.constant 2 : index
    %c0_41 = arith.constant 0 : index
    %58 = vector.load %arg9[%c2_40, %c0_41] : memref<3x64xf32, #tpu.memory_space<vmem>>, vector<1x64xf32>
    %59 = vector.broadcast %58 : vector<1x64xf32> to vector<128x64xf32>
    %60 = arith.mulf %57, %59 : vector<128x64xf32>
    %cst_42 = arith.constant dense<0.000000e+00> : vector<128xf32>
    %61 = vector.multi_reduction <add>, %60, %cst_42 [1] : vector<128x64xf32> to vector<128xf32>
    %62 = vector.shape_cast %61 : vector<128xf32> to vector<128x1xf32>
    %c0_43 = arith.constant 0 : index
    %c0_44 = arith.constant 0 : index
    %63 = memref.load %arg10[%c0_43, %c0_44] : memref<1x1xf32, #tpu.memory_space<smem>>
    %64 = vector.broadcast %63 : f32 to vector<128x1xf32>
    %65 = arith.addf %62, %64 : vector<128x1xf32>
    %66 = arith.negf %65 : vector<128x1xf32>
    %67 = math.exp %66 : vector<128x1xf32>
    %cst_45 = arith.constant 1.000000e+00 : f32
    %68 = vector.broadcast %cst_45 : f32 to vector<128x1xf32>
    %69 = arith.addf %68, %67 : vector<128x1xf32>
    %70 = arith.divf %68, %69 : vector<128x1xf32>
    %c0_46 = arith.constant 0 : index
    %c0_47 = arith.constant 0 : index
    %71 = vector.load %arg11[%c0_46, %c0_47] : memref<128x1xf32, #tpu.memory_space<vmem>>, vector<128x1xf32>
    tpu.vector_store %arg11[%c0_46, %c0_47], %70 {strides = array<i32>} : memref<128x1xf32, #tpu.memory_space<vmem>>, vector<128x1xf32>,
    return
  }
  func.func @transform_0(%arg0: i32) -> (i32, i32) {
    %c0_i32 = arith.constant 0 : i32
    %c0_i32_0 = arith.constant 0 : i32
    return %arg0, %c0_i32 : i32, i32
  }
  func.func @transform_1(%arg0: i32) -> (i32, i32) {
    %c0_i32 = arith.constant 0 : i32
    %c0_i32_0 = arith.constant 0 : i32
    return %arg0, %c0_i32 : i32, i32
  }
  func.func @transform_2(%arg0: i32) -> (i32, i32) {
    %c0_i32 = arith.constant 0 : i32
    %c0_i32_0 = arith.constant 0 : i32
    return %arg0, %c0_i32 : i32, i32
  }
  func.func @transform_3(%arg0: i32) -> (i32, i32) {
    %c0_i32 = arith.constant 0 : i32
    %c0_i32_0 = arith.constant 0 : i32
    return %arg0, %c0_i32 : i32, i32
  }
  func.func @transform_4(%arg0: i32) -> (i32, i32) {
    %c0_i32 = arith.constant 0 : i32
    %c0_i32_0 = arith.constant 0 : i32
    return %arg0, %c0_i32 : i32, i32
  }
  func.func @transform_5(%arg0: i32) -> (i32, i32, i32) {
    %c0_i32 = arith.constant 0 : i32
    %c0_i32_0 = arith.constant 0 : i32
    %c0_i32_1 = arith.constant 0 : i32
    %c0_i32_2 = arith.constant 0 : i32
    return %c0_i32, %c0_i32_0, %c0_i32_1 : i32, i32, i32
  }
  func.func @transform_6(%arg0: i32) -> (i32, i32) {
    %c0_i32 = arith.constant 0 : i32
    %c0_i32_0 = arith.constant 0 : i32
    %c0_i32_1 = arith.constant 0 : i32
    return %c0_i32, %c0_i32_0 : i32, i32
  }
  func.func @transform_7(%arg0: i32) -> (i32, i32) {
    %c0_i32 = arith.constant 0 : i32
    %c0_i32_0 = arith.constant 0 : i32
    %c0_i32_1 = arith.constant 0 : i32
    return %c0_i32, %c0_i32_0 : i32, i32
  }
  func.func @transform_8(%arg0: i32) -> (i32, i32) {
    %c0_i32 = arith.constant 0 : i32
    %c0_i32_0 = arith.constant 0 : i32
    %c0_i32_1 = arith.constant 0 : i32
    return %c0_i32, %c0_i32_0 : i32, i32
  }
  func.func @transform_9(%arg0: i32) -> (i32, i32) {
    %c0_i32 = arith.constant 0 : i32
    %c0_i32_0 = arith.constant 0 : i32
    %c0_i32_1 = arith.constant 0 : i32
    return %c0_i32, %c0_i32_0 : i32, i32
  }
  func.func @transform_10(%arg0: i32) -> (i32, i32) {
    %c0_i32 = arith.constant 0 : i32
    %c0_i32_0 = arith.constant 0 : i32
    return %arg0, %c0_i32 : i32, i32
  }
}

</mosaic_0001>

<bundles_post_ra>
// kernel: tpu_custom_call.1
= control target key start
LH: loop header
LB: loop body
LE: loop exit
PB: predicated region body
PF: predicated region fallthrough
CT: control target
= control target key end

     0   :  { %vm1381_vm4 = vcmask 261120   ;;  %s4025_s0 = inlined_call_operand.vmem [shape: f32[2,128], index: 0, kind: input, shape index: {}]   ;;  %s4026_s1 = inlined_call_operand.vmem [shape: f32[2,128], index: 1, kind: input, shape index: {}]   ;;  %s4027_s2 = inlined_call_operand.vmem [shape: f32[2,128], index: 2, kind: input, shape index: {}]   ;;  %s4028_s3 = inlined_call_operand.vmem [shape: f32[2,128], index: 3, kind: input, shape index: {}]   ;;  %s4029_s4 = inlined_call_operand.vmem [shape: f32[2,1], index: 4, kind: input, shape index: {}]   ;;  %s4030_s5 = inlined_call_operand.vmem [shape: f32[5,128,32], index: 5, kind: input, shape index: {}]   ;;  %s4031_s6 = inlined_call_operand.vmem [shape: f32[3,32], index: 6, kind: input, shape index: {}]   ;;  %s4032_s7 = inlined_call_operand.vmem [shape: f32[32,64], index: 7, kind: input, shape index: {}]   ;;  %s4033_s8 = inlined_call_operand.vmem [shape: f32[3,64], index: 8, kind: input, shape index: {}]   ;;  %s4034_s9 = inlined_call_operand.<no memory space> [shape: f32[1,1], index: 9, kind: input, shape index: {}]   ;;  %s4035_s10 = inlined_call_operand.vmem [shape: f32[2,1], index: 10, kind: output, shape index: {}]  }
   0x1   :  { %v1884_v0 = vld [vmem:[%s4030_s5 + $0x80] sm:$0xff]  ;;  %v1885_v1 = vld [vmem:[%s4030_s5 + $0x88] sm:$0xff]  ;;  %v1886_v5 = vld [vmem:[%s4030_s5 + $0x90] sm:$0xff] }
   0x2   :  { %v1900_v2 = vld [vmem:[%s4030_s5 + $0x100] sm:$0xff]  ;;  %v2478_v3 = vpack.c.bf16 %v1885_v1, %v1884_v0  ;;  %v1901_v4 = vld [vmem:[%s4030_s5 + $0x108] sm:$0xff]  ;;  %v1887_v6 = vld [vmem:[%s4030_s5 + $0x98] sm:$0xff] }
   0x3   :  { %v2542_v7 = vpack.c.bf16 %v1901_v4, %v1900_v2  ;;  %v2482_v8 = vpack.c.bf16 %v1887_v6, %v1886_v5  ;;  %v1902_v9 = vld [vmem:[%s4030_s5 + $0x110] sm:$0xff]  ;;  %v1903_v10 = vld [vmem:[%s4030_s5 + $0x118] sm:$0xff]  ;;  %v1888_v11 = vld [vmem:[%s4030_s5 + $0xa0] sm:$0xff] }
   0x4   :  { %2479 = vmatprep.subr.bf16.mxu1 %v2478_v3  ;;  %v2546_v12 = vpack.c.bf16 %v1903_v10, %v1902_v9  ;;  %v1889_v13 = vld [vmem:[%s4030_s5 + $0xa8] sm:$0xff]  ;;  %v1904_v14 = vld [vmem:[%s4030_s5 + $0x120] sm:$0xff]  ;;  %v1890_v18 = vld [vmem:[%s4030_s5 + $0xb0] sm:$0xff] }
   0x5   :  { %v1905_v15 = vld [vmem:[%s4030_s5 + $0x128] sm:$0xff]  ;;  %2543 = vmatprep.subr.bf16.mxu0 %v2542_v7  ;;  %2481 = vmatpush3.bf16.msra.mxu1 %v2478_v3  ;;  %v2486_v16 = vpack.c.bf16 %v1889_v13, %v1888_v11  ;;  %v1891_v19 = vld [vmem:[%s4030_s5 + $0xb8] sm:$0xff]  ;;  %v1906_v20 = vld [vmem:[%s4030_s5 + $0x130] sm:$0xff] }
   0x6   :  { %2545 = vmatpush3.bf16.msra.mxu0 %v2542_v7  ;;  %2483 = vmatprep.subr.bf16.mxu1 %v2482_v8  ;;  %v2550_v17 = vpack.c.bf16 %v1905_v15, %v1904_v14  ;;  %v1907_v21 = vld [vmem:[%s4030_s5 + $0x138] sm:$0xff]  ;;  %v2490_v22 = vpack.c.bf16 %v1891_v19, %v1890_v18  ;;  %v1892_v23 = vld [vmem:[%s4030_s5 + $0xc0] sm:$0xff]  ;;  %v1893_v24 = vld [vmem:[%s4030_s5 + $0xc8] sm:$0xff] }
   0x7   :  { %2547 = vmatprep.subr.bf16.mxu0 %v2546_v12  ;;  %v2554_v25 = vpack.c.bf16 %v1907_v21, %v1906_v20  ;;  %v1908_v26 = vld [vmem:[%s4030_s5 + $0x140] sm:$0xff]  ;;  %v1909_v27 = vld [vmem:[%s4030_s5 + $0x148] sm:$0xff]  ;;  %v2494_v35 = vpack.c.bf16 %v1893_v24, %v1892_v23  ;;  %v1894_v39 = vld [vmem:[%s4030_s5 + $0xd0] sm:$0xff] }
   0x8   :  { %v2928_v28 = vld [vmem:[%s4025_s0] sm:$0xff]  ;;  %v2946_v36 = vld [vmem:[%s4026_s1 + $0x8] sm:$0xff]  ;;  %v2558_v38 = vpack.c.bf16 %v1909_v27, %v1908_v26  ;;  %v1895_v40 = vld [vmem:[%s4030_s5 + $0xd8] sm:$0xff] }
   0x9   :  { %2485 = vmatpush3.bf16.msra.mxu1 %v2482_v8  ;;  %v52_v29 = vld [vmem:[%s4026_s1] sm:$0xff]  ;;  %v2951_v37 = vld [vmem:[%s4028_s3 + $0x8] sm:$0xff]  ;;  %v1910_v43 = vld [vmem:[%s4030_s5 + $0x150] sm:$0xff]  ;;  %v2498_v45 = vpack.c.bf16 %v1895_v40, %v1894_v39 }
   0xa   :  { %2549 = vmatpush3.bf16.msra.mxu0 %v2546_v12  ;;  %2487 = vmatprep.subr.bf16.mxu1 %v2486_v16  ;;  %v2936_v30 = vld [vmem:[%s4027_s2] sm:$0xff]  ;;  %v2961_v42 = vadd.f32 %v2951_v37, %v2946_v36  ;;  %v1911_v44 = vld [vmem:[%s4030_s5 + $0x158] sm:$0xff]  ;;  %v1897_v48 = vld [vmem:[%s4030_s5 + $0xe8] sm:$0xff]  ;;  %v488_v40 = vmul.f32 %v2951_v37, %v2946_v36 }
   0xb   :  { %2551 = vmatprep.subr.bf16.mxu0 %v2550_v17  ;;  %v84_v31 = vld [vmem:[%s4028_s3] sm:$0xff]  ;;  %v148_v33 = vmul.f32 %v2936_v30, %v52_v29  ;;  %v2562_v46 = vpack.c.bf16 %v1911_v44, %v1910_v43  ;;  %v1913_v50 = vld [vmem:[%s4030_s5 + $0x168] sm:$0xff]  ;;  %v1898_v53 = vld [vmem:[%s4030_s5 + $0xf0] sm:$0xff] }
   0xc   :  { %v132_v32 = vmul.f32 %v84_v31, %v2928_v28  ;;  %v487_v34 = vmul.f32 %v84_v31, %v52_v29  ;;  %4050 = vst [vmem:[#allocation4_spill] sm:$0xff] %v2961_v42  ;;  %v1896_v47 = vld [vmem:[%s4030_s5 + $0xe0] sm:$0xff]  ;;  %v1899_v54 = vld [vmem:[%s4030_s5 + $0xf8] sm:$0xff]  ;;  %v1914_v55 = vld [vmem:[%s4030_s5 + $0x170] sm:$0xff]  ;;  %v2998_v58 = vadd.f32 %v84_v31, %v52_v29 }
   0xd   :  { %2489 = vmatpush3.bf16.msra.mxu1 %v2486_v16  ;;  %v1912_v49 = vld [vmem:[%s4030_s5 + $0x160] sm:$0xff]  ;;  %v2502_v51 = vpack.c.bf16 %v1897_v48, %v1896_v47  ;;  %v1915_v56 = vld [vmem:[%s4030_s5 + $0x178] sm:$0xff]  ;;  %v2996_v57 = vld [vmem:[%s4025_s0 + $0x8] sm:$0xff]  ;;  %v2506_v62 = vpack.c.bf16 %v1899_v54, %v1898_v53 }
   0xe   :  { %2553 = vmatpush3.bf16.msra.mxu0 %v2550_v17  ;;  %2491 = vmatprep.subr.bf16.mxu1 %v2490_v22  ;;  %v164_v41 = vadd.f32 %v148_v33, %v132_v32  ;;  %v2566_v52 = vpack.c.bf16 %v1913_v50, %v1912_v49  ;;  %4051 = vst [vmem:[#allocation5_spill] sm:$0xff] %v2998_v58  ;;  %v3003_v59 = vld [vmem:[%s4027_s2 + $0x8] sm:$0xff]  ;;  %v116_v60 = vld [vmem:[%s4030_s5] sm:$0xff]  ;;  %v3020_v1 = vld [vmem:[%s4025_s0 + $0x10] sm:$0xff] }
   0xf   :  { %2555 = vmatprep.subr.bf16.mxu0 %v2554_v25  ;;  %2310 = vmatprep.mubr.f32.mxu0 %v487_v34  ;;  %v117_v61 = vld [vmem:[%s4030_s5 + $0x8] sm:$0xff]  ;;  %v1916_v63 = vld [vmem:[%s4030_s5 + $0x180] sm:$0xff]  ;;  %v54_v2 = vld [vmem:[%s4026_s1 + $0x10] sm:$0xff]  ;;  %v2570_v3 = vpack.c.bf16 %v1915_v56, %v1914_v55  ;;  %v133_v7 = vmul.f32 %v2951_v37, %v2996_v57  ;;  %v149_v8 = vmul.f32 %v3003_v59, %v2946_v36 }
  0x10   :  { %2198 = vmatprep.mubr.f32.mxu1 %v164_v41  ;;  %v1917_v0 = vld [vmem:[%s4030_s5 + $0x188] sm:$0xff]  ;;  %v3028_v4 = vld [vmem:[%s4027_s2 + $0x10] sm:$0xff]  ;;  %v3036_v6 = vld [vmem:[%s4025_s0 + $0x18] sm:$0xff]  ;;  %v2510_v16 = vpack.c.bf16 %v117_v61, %v116_v60 }
  0x11   :  { %2493 = vmatpush3.bf16.msra.mxu1 %v2490_v22  ;;  %v86_v5 = vld [vmem:[%s4028_s3 + $0x10] sm:$0xff]  ;;  %v55_v9 = vld [vmem:[%s4026_s1 + $0x18] sm:$0xff]  ;;  %v3058_v13 = vld [vmem:[%s4025_s0 + $0x20] sm:$0xff]  ;;  %v150_v18 = vmul.f32 %v3028_v4, %v54_v2  ;;  %v2574_v24 = vpack.c.bf16 %v1917_v0, %v1916_v63  ;;  %v165_v31 = vadd.f32 %v149_v8, %v133_v7 }
  0x12   :  { %2557 = vmatpush3.bf16.msra.mxu0 %v2554_v25  ;;  %2495 = vmatprep.subr.bf16.mxu1 %v2494_v35  ;;  %v3048_v10 = vld [vmem:[%s4027_s2 + $0x18] sm:$0xff]  ;;  %v3053_v12 = vadd.f32 %v86_v5, %v54_v2  ;;  %v56_v14 = vld [vmem:[%s4026_s1 + $0x20] sm:$0xff]  ;;  %v134_v17 = vmul.f32 %v86_v5, %v3020_v1  ;;  %v118_v19 = vld [vmem:[%s4030_s5 + $0x10] sm:$0xff] }
  0x13   :  { %2559 = vmatprep.subr.bf16.mxu0 %v2558_v38  ;;  %v87_v11 = vld [vmem:[%s4028_s3 + $0x18] sm:$0xff]  ;;  %v3066_v15 = vld [vmem:[%s4027_s2 + $0x20] sm:$0xff]  ;;  %v3082_v22 = vld [vmem:[%s4025_s0 + $0x28] sm:$0xff]  ;;  %v151_v33 = vmul.f32 %v3048_v10, %v55_v9 }
  0x14   :  { %4052 = vst [vmem:[#allocation6_spill] sm:$0xff] %v3053_v12  ;;  %v119_v20 = vld [vmem:[%s4030_s5 + $0x18] sm:$0xff]  ;;  %v88_v21 = vld [vmem:[%s4028_s3 + $0x20] sm:$0xff]  ;;  %v3087_v23 = vld [vmem:[%s4026_s1 + $0x28] sm:$0xff]  ;;  %v135_v32 = vmul.f32 %v87_v11, %v3036_v6  ;;  %v3124_v39 = vadd.f32 %v87_v11, %v55_v9  ;;  %v152_v44 = vmul.f32 %v3066_v15, %v56_v14  ;;  %v166_v47 = vadd.f32 %v150_v18, %v134_v17 }
  0x15   :  { %2497 = vmatpush3.bf16.msra.mxu1 %v2494_v35  ;;  %v1918_v25 = vld [vmem:[%s4030_s5 + $0x190] sm:$0xff]  ;;  %v3095_v26 = vld [vmem:[%s4027_s2 + $0x28] sm:$0xff]  ;;  %v1919_v41 = vld [vmem:[%s4030_s5 + $0x198] sm:$0xff]  ;;  %v136_v43 = vmul.f32 %v88_v21, %v3058_v13  ;;  %v490_v63 = vmul.f32 %v87_v11, %v55_v9  ;;  %v3199_v9 = vadd.f32 %v88_v21, %v56_v14  ;;  %v491_v17 = vmul.f32 %v88_v21, %v56_v14 }
  0x16   :  { %2561 = vmatpush3.bf16.msra.mxu0 %v2558_v38  ;;  %2499 = vmatprep.subr.bf16.mxu1 %v2498_v45  ;;  %v3100_v27 = vld [vmem:[%s4028_s3 + $0x28] sm:$0xff]  ;;  %v3105_v29 = vld [vmem:[%s4025_s0 + $0x30] sm:$0xff]  ;;  %4053 = vst [vmem:[#allocation7_spill] sm:$0xff] %v3124_v39  ;;  %v153_v37 = vmul.f32 %v3095_v26, %v3087_v23  ;;  %v1920_v48 = vld [vmem:[%s4030_s5 + $0x1a0] sm:$0xff]  ;;  %v2578_v0 = vpack.c.bf16 %v1919_v41, %v1918_v25 }
  0x17   :  { %2563 = vmatprep.subr.bf16.mxu0 %v2562_v46  ;;  %v3112_v34 = vld [vmem:[%s4026_s1 + $0x30] sm:$0xff]  ;;  %v137_v36 = vmul.f32 %v3100_v27, %v3082_v22  ;;  %v1921_v49 = vld [vmem:[%s4030_s5 + $0x1a8] sm:$0xff]  ;;  %v3152_v50 = vld [vmem:[%s4026_s1 + $0x38] sm:$0xff]  ;;  %4055 = vst [vmem:[#allocation9_spill] sm:$0xff] %v3199_v9  ;;  %v168_v11 = vadd.f32 %v152_v44, %v136_v43  ;;  %v492_v14 = vmul.f32 %v3100_v27, %v3087_v23 }
  0x18   :  { %v3117_v35 = vld [vmem:[%s4027_s2 + $0x30] sm:$0xff]  ;;  %v3161_v55 = vld [vmem:[%s4025_s0 + $0x38] sm:$0xff]  ;;  %v3176_v61 = vld [vmem:[%s4025_s0 + $0x40] sm:$0xff]  ;;  %v2582_v21 = vpack.c.bf16 %v1921_v49, %v1920_v48 }
  0x19   :  { %2501 = vmatpush3.bf16.msra.mxu1 %v2498_v45  ;;  %v3122_v38 = vld [vmem:[%s4028_s3 + $0x30] sm:$0xff]  ;;  %v120_v45 = vld [vmem:[%s4030_s5 + $0x20] sm:$0xff]  ;;  %v154_v54 = vmul.f32 %v3117_v35, %v3112_v34  ;;  %v3166_v56 = vld [vmem:[%s4027_s2 + $0x38] sm:$0xff] }
  0x1a   :  { %2565 = vmatpush3.bf16.msra.mxu0 %v2562_v46  ;;  %2503 = vmatprep.subr.bf16.mxu1 %v2502_v51  ;;  %v121_v46 = vld [vmem:[%s4030_s5 + $0x28] sm:$0xff]  ;;  %v138_v53 = vmul.f32 %v3122_v38, %v3105_v29  ;;  %v3171_v60 = vld [vmem:[%s4028_s3 + $0x38] sm:$0xff]  ;;  %v3192_v7 = vld [vmem:[%s4027_s2 + $0x40] sm:$0xff]  ;;  %v493_v43 = vmul.f32 %v3122_v38, %v3112_v34  ;;  %v155_v44 = vmul.f32 %v3166_v56, %v3152_v50 }
  0x1b   :  { %2567 = vmatprep.subr.bf16.mxu0 %v2566_v52  ;;  %4054 = vst [vmem:[#allocation8_spill] sm:$0xff] %v3192_v7  ;;  %v3197_v8 = vld [vmem:[%s4028_s3 + $0x40] sm:$0xff]  ;;  %v2518_v18 = vpack.c.bf16 %v121_v46, %v120_v45  ;;  %v3214_v25 = vld [vmem:[%s4027_s2 + $0x48] sm:$0xff]  ;;  %v3246_v45 = vld [vmem:[%s4027_s2 + $0x50] sm:$0xff] }
  0x1c   :  { %4057 = vst [vmem:[#allocation11_spill] sm:$0xff] %v3214_v25  ;;  %v170_v41 = vadd.f32 %v154_v54, %v138_v53  ;;  %4059 = vst [vmem:[#allocation13_spill] sm:$0xff] %v3246_v45  ;;  %v3251_v46 = vld [vmem:[%s4028_s3 + $0x50] sm:$0xff]  ;;  %v3267_v49 = vld [vmem:[%s4026_s1 + $0x58] sm:$0xff] }
  0x1d   :  { %2505 = vmatpush3.bf16.msra.mxu1 %v2502_v51  ;;  %v489_v51 = vmul.f32 %v86_v5, %v54_v2  ;;  %v122_v2 = vld [vmem:[%s4030_s5 + $0x30] sm:$0xff]  ;;  %v3187_v5 = vld [vmem:[%s4026_s1 + $0x40] sm:$0xff]  ;;  %v3277_v53 = vld [vmem:[%s4028_s3 + $0x58] sm:$0xff] }
  0x1e   :  { %2569 = vmatpush3.bf16.msra.mxu0 %v2566_v52  ;;  %2507 = vmatprep.subr.bf16.mxu1 %v2506_v62  ;;  %v2514_v52 = vpack.c.bf16 %v119_v20, %v118_v19  ;;  %v3204_v19 = vld [vmem:[%s4025_s0 + $0x48] sm:$0xff]  ;;  %v156_v48 = vmul.f32 %v3192_v7, %v3187_v5  ;;  %v124_v39 = vld [vmem:[%s4030_s5 + $0x40] sm:$0xff] }
  0x1f   :  { %2571 = vmatprep.subr.bf16.mxu0 %v2570_v3  ;;  %4056 = vst [vmem:[#allocation10_spill] sm:$0xff] %v3204_v19  ;;  %v3209_v20 = vld [vmem:[%s4026_s1 + $0x48] sm:$0xff] }
  0x20   :  { %v157_v9 = vmul.f32 %v3214_v25, %v3209_v20  ;;  %v126_v25 = vld [vmem:[%s4030_s5 + $0x50] sm:$0xff]  ;;  %v3342_v7 = vld [vmem:[%s4025_s0 + $0x68] sm:$0xff] }
  0x21   :  { %2509 = vmatpush3.bf16.msra.mxu1 %v2506_v62  ;;  %v167_v62 = vadd.f32 %v151_v33, %v135_v32  ;;  %v1923_v32 = vld [vmem:[%s4030_s5 + $0x1b8] sm:$0xff]  ;;  %v3227_v33 = vld [vmem:[%s4028_s3 + $0x48] sm:$0xff] }
  0x22   :  { %2573 = vmatpush3.bf16.msra.mxu0 %v2570_v3  ;;  %2511 = vmatprep.subr.bf16.mxu1 %v2510_v16  ;;  %v123_v3 = vld [vmem:[%s4030_s5 + $0x38] sm:$0xff]  ;;  %v141_v12 = vmul.f32 %v3227_v33, %v3204_v19  ;;  %v3327_v19 = vld [vmem:[%s4026_s1 + $0x60] sm:$0xff] }
  0x23   :  { %2575 = vmatprep.subr.bf16.mxu0 %v2574_v24  ;;  %v2522_v54 = vpack.c.bf16 %v123_v3, %v122_v2  ;;  %v1925_v2 = vld [vmem:[%s4030_s5 + $0x1c8] sm:$0xff] }
  0x24   :  { %2199 = vmatmul.mubr.f32.vlgmr.msra.gmra.mrb[0].mxu1 %v165_v31  ;;  %v1922_v31 = vld [vmem:[%s4030_s5 + $0x1b0] sm:$0xff] }
  0x25   :  { %2311 = vmatmul.mubr.f32.vlgmr.msra.gmra.mrb[0].mxu0 %v488_v40  ;;  %2513 = vmatpush3.bf16.msra.mxu1 %v2510_v16  ;;  %v169_v16 = vadd.f32 %v153_v37, %v137_v36  ;;  %v3237_v40 = vld [vmem:[%s4026_s1 + $0x50] sm:$0xff]  ;;  %v139_v36 = vmul.f32 %v3171_v60, %v3161_v55  ;;  %v140_v37 = vmul.f32 %v3197_v8, %v3176_v61 }
  0x26   :  { %2577 = vmatpush3.bf16.msra.mxu0 %v2574_v24  ;;  %2201 = vmatprep.mubr.f32.mxu1 %v166_v47  ;;  %v3232_v24 = vld [vmem:[%s4025_s0 + $0x50] sm:$0xff]  ;;  %v3256_v47 = vld [vmem:[%s4025_s0 + $0x58] sm:$0xff] }
  0x27   :  { %4058 = vst [vmem:[#allocation12_spill] sm:$0xff] %v3232_v24  ;;  %2313 = vmatprep.mubr.f32.mxu0 %v489_v51  ;;  %2515 = vmatprep.subr.bf16.mxu1 %v2514_v52  ;;  %4060 = vst [vmem:[#allocation14_spill] sm:$0xff] %v3256_v47  ;;  %v3272_v51 = vld [vmem:[%s4027_s2 + $0x58] sm:$0xff]  ;;  %v142_v3 = vmul.f32 %v3251_v46, %v3232_v24  ;;  %v143_v42 = vmul.f32 %v3277_v53, %v3256_v47 }
  0x28   :  { %2202 = vmatmul.mubr.f32.gmra.mrb[2].mxu1 %v167_v62  ;;  %2579 = vmatprep.subr.bf16.mxu0 %v2578_v0  ;;  %4061 = vst [vmem:[#allocation15_spill] sm:$0xff] %v3272_v51  ;;  %v494_v62 = vmul.f32 %v3171_v60, %v3152_v50  ;;  %v159_v58 = vmul.f32 %v3272_v51, %v3267_v49  ;;  %v127_v24 = vld [vmem:[%s4030_s5 + $0x58] sm:$0xff] }
  0x29   :  { %2314 = vmatmul.mubr.f32.gmra.mrb[2].mxu0 %v490_v63  ;;  %2517 = vmatpush3.bf16.msra.mxu1 %v2514_v52  ;;  %v125_v52 = vld [vmem:[%s4030_s5 + $0x48] sm:$0xff]  ;;  %v1924_v63 = vld [vmem:[%s4030_s5 + $0x1c0] sm:$0xff]  ;;  %v495_v47 = vmul.f32 %v3197_v8, %v3187_v5  ;;  %v1927_v51 = vld [vmem:[%s4030_s5 + $0x1d8] sm:$0xff] }
  0x2a   :  { %2581 = vmatpush3.bf16.msra.mxu0 %v2578_v0  ;;  %2204 = vmatprep.mubr.f32.mxu1 %v168_v11  ;;  %v158_v0 = vmul.f32 %v3246_v45, %v3237_v40  ;;  %v2586_v11 = vpack.c.bf16 %v1923_v32, %v1922_v31  ;;  %v171_v31 = vadd.f32 %v155_v44, %v139_v36  ;;  %v3322_v45 = vld [vmem:[%s4025_s0 + $0x60] sm:$0xff] }
  0x2b   :  { %2316 = vmatprep.mubr.f32.mxu0 %v491_v17  ;;  %2519 = vmatprep.subr.bf16.mxu1 %v2518_v18  ;;  %v1926_v17 = vld [vmem:[%s4030_s5 + $0x1d0] sm:$0xff]  ;;  %v172_v32 = vadd.f32 %v156_v48, %v140_v37  ;;  %v496_v44 = vmul.f32 %v3227_v33, %v3209_v20  ;;  %v2590_v36 = vpack.c.bf16 %v1925_v2, %v1924_v63  ;;  %v3334_v37 = vld [vmem:[%s4027_s2 + $0x60] sm:$0xff]  ;;  %v3354_v63 = vld [vmem:[%s4027_s2 + $0x68] sm:$0xff] }
  0x2c   :  { %2205 = vmatmul.mubr.f32.gmra.mrb[4].mxu1 %v169_v16  ;;  %2583 = vmatprep.subr.bf16.mxu0 %v2582_v21  ;;  %v2526_v16 = vpack.c.bf16 %v125_v52, %v124_v39  ;;  %v96_v48 = vld [vmem:[%s4028_s3 + $0x60] sm:$0xff]  ;;  %v173_v39 = vadd.f32 %v157_v9, %v141_v12  ;;  %v3349_v52 = vld [vmem:[%s4026_s1 + $0x68] sm:$0xff]  ;;  %v175_v12 = vadd.f32 %v159_v58, %v143_v42 }
  0x2d   :  { %2317 = vmatmul.mubr.f32.gmra.mrb[4].mxu0 %v492_v14  ;;  %2521 = vmatpush3.bf16.msra.mxu1 %v2518_v18  ;;  %v174_v18 = vadd.f32 %v158_v0, %v142_v3  ;;  %v497_v14 = vmul.f32 %v3251_v46, %v3237_v40  ;;  %v2530_v9 = vpack.c.bf16 %v127_v24, %v126_v25  ;;  %v128_v25 = vld [vmem:[%s4030_s5 + $0x60] sm:$0xff] }
  0x2e   :  { %2585 = vmatpush3.bf16.msra.mxu0 %v2582_v21  ;;  %2207 = vmatprep.mubr.f32.mxu1 %v170_v41  ;;  %v3359_v21 = vld [vmem:[%s4028_s3 + $0x68] sm:$0xff]  ;;  %v2594_v41 = vpack.c.bf16 %v1927_v51, %v1926_v17  ;;  %v144_v2 = vmul.f32 %v96_v48, %v3322_v45  ;;  %v160_v3 = vmul.f32 %v3334_v37, %v3327_v19 }
  0x2f   :  { %2319 = vmatprep.mubr.f32.mxu0 %v493_v43  ;;  %2523 = vmatprep.subr.bf16.mxu1 %v2522_v54  ;;  %v3366_v0 = vadd.f32 %v3100_v27, %v3087_v23  ;;  %v145_v43 = vmul.f32 %v3359_v21, %v3342_v7  ;;  %v161_v42 = vmul.f32 %v3354_v63, %v3349_v52  ;;  %v3382_v23 = vld [vmem:[%s4025_s0 + $0x70] sm:$0xff] }
  0x30   :  { %2208 = vmatmul.mubr.f32.gmra.mrb[6].mxu1 %v171_v31  ;;  %2587 = vmatprep.subr.bf16.mxu0 %v2586_v11  ;;  %v3374_v58 = vadd.f32 %v3122_v38, %v3112_v34  ;;  %v66_v27 = vld [vmem:[%s4026_s1 + $0x70] sm:$0xff]  ;;  %v3394_v38 = vadd.f32 %v3171_v60, %v3152_v50  ;;  %v3398_v24 = vadd.f32 %v3197_v8, %v3187_v5  ;;  %v99_v50 = vld [vmem:[%s4028_s3 + $0x78] sm:$0xff] }
  0x31   :  { %2320 = vmatmul.mubr.f32.gmra.mrb[6].mxu0 %v494_v62  ;;  %2525 = vmatpush3.bf16.msra.mxu1 %v2522_v54  ;;  %v3390_v34 = vld [vmem:[%s4027_s2 + $0x70] sm:$0xff]  ;;  %v3402_v51 = vadd.f32 %v3227_v33, %v3209_v20  ;;  %v67_v62 = vld [vmem:[%s4026_s1 + $0x78] sm:$0xff]  ;;  %v3415_v60 = vadd.f32 %v3251_v46, %v3237_v40  ;;  %v3419_v5 = vadd.f32 %v3277_v53, %v3267_v49  ;;  %v129_v20 = vld [vmem:[%s4030_s5 + $0x68] sm:$0xff] }
  0x32   :  { %2589 = vmatpush3.bf16.msra.mxu0 %v2586_v11  ;;  %2210 = vmatprep.mubr.f32.mxu1 %v172_v32  ;;  %v98_v54 = vld [vmem:[%s4028_s3 + $0x70] sm:$0xff]  ;;  %v3422_v8 = vadd.f32 %v96_v48, %v3327_v19  ;;  %v1928_v33 = vld [vmem:[%s4030_s5 + $0x1e0] sm:$0xff]  ;;  %v1929_v40 = vld [vmem:[%s4030_s5 + $0x1e8] sm:$0xff]  ;;  %v3435_v46 = vadd.f32 %v3359_v21, %v3349_v52  ;;  %v3439_v11 = vadd.f32 %v99_v50, %v67_v62 }
  0x33   :  { %2322 = vmatprep.mubr.f32.mxu0 %v495_v47  ;;  %2527 = vmatprep.subr.bf16.mxu1 %v2526_v16  ;;  %v3437_v47 = vadd.f32 %v98_v54, %v66_v27  ;;  %v498_v17 = vmul.f32 %v3277_v53, %v3267_v49  ;;  %v3446_v31 = vld [vmem:[%s4025_s0 + $0x78] sm:$0xff]  ;;  %v499_v49 = vmul.f32 %v96_v48, %v3327_v19  ;;  %v1930_v48 = vld [vmem:[%s4030_s5 + $0x1f0] sm:$0xff] }
  0x34   :  { %4062 = vst [vmem:[#allocation16_spill] sm:$0xff] %v3422_v8  ;;  %2211 = vmatmul.mubr.f32.gmra.mrb[8].mxu1 %v173_v39  ;;  %2591 = vmatprep.subr.bf16.mxu0 %v2590_v36  ;;  %4063 = vst [vmem:[#allocation17_spill] sm:$0xff] %v3435_v46  ;;  %v3451_v32 = vld [vmem:[%s4027_s2 + $0x78] sm:$0xff]  ;;  %v176_v39 = vadd.f32 %v160_v3, %v144_v2  ;;  %v2534_v53 = vpack.c.bf16 %v129_v20, %v128_v25 }
  0x35   :  { %4064 = vst [vmem:[#allocation18_spill] sm:$0xff] %v3437_v47  ;;  %4065 = vst [vmem:[#allocation19_spill] sm:$0xff] %v3439_v11  ;;  %2323 = vmatmul.mubr.f32.gmra.mrb[8].mxu0 %v496_v44  ;;  %2529 = vmatpush3.bf16.msra.mxu1 %v2526_v16  ;;  %v146_v11 = vmul.f32 %v98_v54, %v3382_v23  ;;  %v162_v16 = vmul.f32 %v3390_v34, %v66_v27 }
  0x36   :  { %2593 = vmatpush3.bf16.msra.mxu0 %v2590_v36  ;;  %2213 = vmatprep.mubr.f32.mxu1 %v174_v18  ;;  %v2598_v44 = vpack.c.bf16 %v1929_v40, %v1928_v33  ;;  %v177_v47 = vadd.f32 %v161_v42, %v145_v43  ;;  %v147_v46 = vmul.f32 %v99_v50, %v3446_v31  ;;  %v130_v36 = vld [vmem:[%s4030_s5 + $0x70] sm:$0xff]  ;;  %v131_v18 = vld [vmem:[%s4030_s5 + $0x78] sm:$0xff] }
  0x37   :  { %2325 = vmatprep.mubr.f32.mxu0 %v497_v14  ;;  %2531 = vmatprep.subr.bf16.mxu1 %v2530_v9  ;;  %v163_v8 = vmul.f32 %v3451_v32, %v67_v62  ;;  %v500_v19 = vmul.f32 %v3359_v21, %v3349_v52  ;;  %v1931_v14 = vld [vmem:[%s4030_s5 + $0x1f8] sm:$0xff]  ;;  %v501_v2 = vmul.f32 %v98_v54, %v66_v27  ;;  %v1932_v52 = vld [vmem:[%s4030_s5 + $0x200] sm:$0xff]  ;;  %v1933_v21 = vld [vmem:[%s4030_s5 + $0x208] sm:$0xff] }
  0x38   :  { %2214 = vmatmul.mubr.f32.gmra.mrb[10].mxu1 %v175_v12  ;;  %2595 = vmatprep.subr.bf16.mxu0 %v2594_v41  ;;  %v178_v12 = vadd.f32 %v162_v16, %v146_v11  ;;  %v2538_v3 = vpack.c.bf16 %v131_v18, %v130_v36  ;;  %v2602_v43 = vpack.c.bf16 %v1931_v14, %v1930_v48  ;;  %v1938_v11 = vld [vmem:[%s4030_s5 + $0x230] sm:$0xff]  ;;  %v1940_v16 = vld [vmem:[%s4030_s5 + $0x240] sm:$0xff]  ;;  %v4068_v36 = vld [vmem:[#allocation11_spill] sm:$0xff] }
  0x39   :  { %2326 = vmatmul.mubr.f32.gmra.mrb[10].mxu0 %v498_v17  ;;  %2533 = vmatpush3.bf16.msra.mxu1 %v2530_v9  ;;  %v179_v9 = vadd.f32 %v163_v8, %v147_v46  ;;  %v100_v42 = vmul.f32 %v2936_v30, %v2928_v28  ;;  %v681_v25 = vadd.f32 %v2936_v30, %v2928_v28  ;;  %v4070_v48 = vld [vmem:[#allocation13_spill] sm:$0xff] }
  0x3a   :  { %2597 = vmatpush3.bf16.msra.mxu0 %v2594_v41  ;;  %2216 = vmatprep.mubr.f32.mxu1 %v176_v39  ;;  %v502_v41 = vmul.f32 %v99_v50, %v67_v62  ;;  %v2606_v27 = vpack.c.bf16 %v1933_v21, %v1932_v52  ;;  %v101_v54 = vmul.f32 %v3003_v59, %v2996_v57  ;;  %v1934_v62 = vld [vmem:[%s4030_s5 + $0x210] sm:$0xff]  ;;  %v1935_v50 = vld [vmem:[%s4030_s5 + $0x218] sm:$0xff]  ;;  %v1944_v52 = vld [vmem:[%s4030_s5 + $0x260] sm:$0xff] }
  0x3b   :  { %2328 = vmatprep.mubr.f32.mxu0 %v499_v49  ;;  %2535 = vmatprep.subr.bf16.mxu1 %v2534_v53  ;;  %v682_v8 = vadd.f32 %v3003_v59, %v2996_v57  ;;  %v102_v28 = vmul.f32 %v3028_v4, %v3020_v1  ;;  %v683_v30 = vadd.f32 %v3028_v4, %v3020_v1  ;;  %v1936_v57 = vld [vmem:[%s4030_s5 + $0x220] sm:$0xff]  ;;  %v1937_v59 = vld [vmem:[%s4030_s5 + $0x228] sm:$0xff] }
  0x3c   :  { %2217 = vmatmul.mubr.f32.gmra.mrb[12].mxu1 %v177_v47  ;;  %2599 = vmatprep.subr.bf16.mxu0 %v2598_v44  ;;  %v2610_v20 = vpack.c.bf16 %v1935_v50, %v1934_v62  ;;  %v103_v33 = vmul.f32 %v3048_v10, %v3036_v6  ;;  %v684_v1 = vadd.f32 %v3048_v10, %v3036_v6  ;;  %v1939_v6 = vld [vmem:[%s4030_s5 + $0x238] sm:$0xff]  ;;  %v1945_v21 = vld [vmem:[%s4030_s5 + $0x268] sm:$0xff]  ;;  %v1946_v62 = vld [vmem:[%s4030_s5 + $0x270] sm:$0xff] }
  0x3d   :  { %2329 = vmatmul.mubr.f32.gmra.mrb[12].mxu0 %v500_v19  ;;  %2537 = vmatpush3.bf16.msra.mxu1 %v2534_v53  ;;  %v104_v4 = vmul.f32 %v3066_v15, %v3058_v13  ;;  %v685_v40 = vadd.f32 %v3066_v15, %v3058_v13  ;;  %v2614_v46 = vpack.c.bf16 %v1937_v59, %v1936_v57  ;;  %v1942_v19 = vld [vmem:[%s4030_s5 + $0x250] sm:$0xff]  ;;  %v1947_v50 = vld [vmem:[%s4030_s5 + $0x278] sm:$0xff] }
  0x3e   :  { %2601 = vmatpush3.bf16.msra.mxu0 %v2598_v44  ;;  %2219 = vmatprep.mubr.f32.mxu1 %v178_v12  ;;  %v105_v47 = vmul.f32 %v3095_v26, %v3082_v22  ;;  %v686_v10 = vadd.f32 %v3095_v26, %v3082_v22  ;;  %v106_v13 = vmul.f32 %v3117_v35, %v3105_v29  ;;  %v1941_v22 = vld [vmem:[%s4030_s5 + $0x248] sm:$0xff]  ;;  %v4067_v44 = vld [vmem:[#allocation10_spill] sm:$0xff]  ;;  %v4081_v59 = vld [vmem:[#allocation19_spill] sm:$0xff] }
  0x3f   :  { %2331 = vmatprep.mubr.f32.mxu0 %v501_v2  ;;  %2539 = vmatprep.subr.bf16.mxu1 %v2538_v3  ;;  %v687_v15 = vadd.f32 %v3117_v35, %v3105_v29  ;;  %v2618_v17 = vpack.c.bf16 %v1939_v6, %v1938_v11  ;;  %v107_v39 = vmul.f32 %v3166_v56, %v3161_v55  ;;  %v4066_v29 = vld [vmem:[#allocation8_spill] sm:$0xff]  ;;  %v4080_v57 = vld [vmem:[#allocation18_spill] sm:$0xff]  ;;  %v1267_v6 = vld [vmem:[%s4029_s4 + $0x38] sm:$0xff] }
  0x40   :  { %2220 = vmatmul.mubr.f32.gmra.mrb[14].mxu1 %v179_v9  ;;  %2603 = vmatprep.subr.bf16.mxu0 %v2602_v43  ;;  %v688_v26 = vadd.f32 %v3166_v56, %v3161_v55  ;;  %v108_v35 = vmul.f32 %v4066_v29, %v3176_v61  ;;  %v689_v49 = vadd.f32 %v4066_v29, %v3176_v61  ;;  %v1943_v55 = vld [vmem:[%s4030_s5 + $0x258] sm:$0xff]  ;;  %v4069_v61 = vld [vmem:[#allocation12_spill] sm:$0xff]  ;;  %v1274_v29 = vld [vmem:[%s4029_s4 + $0x70] sm:$0xff] }
  0x41   :  { %2332 = vmatmul.mubr.f32.gmra.mrb[14].mxu0 %v502_v41  ;;  %2541 = vmatpush3.bf16.msra.mxu1 %v2538_v3  ;;  %v2622_v53 = vpack.c.bf16 %v1941_v22, %v1940_v16  ;;  %v109_v18 = vmul.f32 %v4068_v36, %v4067_v44  ;;  %v690_v56 = vadd.f32 %v4068_v36, %v4067_v44  ;;  %v4071_v3 = vld [vmem:[#allocation14_spill] sm:$0xff]  ;;  %v4072_v9 = vld [vmem:[#allocation15_spill] sm:$0xff]  ;;  %v1264_v11 = vld [vmem:[%s4029_s4 + $0x20] sm:$0xff] }
  0x42   :  { %2605 = vmatpush3.bf16.msra.mxu0 %v2602_v43  ;;  %2254 = vmatprep.mubr.f32.mxu1 %v100_v42  ;;  %v110_v14 = vmul.f32 %v4070_v48, %v4069_v61  ;;  %v691_v12 = vadd.f32 %v4070_v48, %v4069_v61  ;;  %v2626_v2 = vpack.c.bf16 %v1943_v55, %v1942_v19  ;;  %v1273_v16 = vld [vmem:[%s4029_s4 + $0x68] sm:$0xff]  ;;  %v1272_v22 = vld [vmem:[%s4029_s4 + $0x60] sm:$0xff] }
  0x43   :  { %2366 = vmatprep.mubr.f32.mxu0 %v681_v25  ;;  %2607 = vmatprep.subr.bf16.mxu0 %v2606_v27  ;;  %v111_v43 = vmul.f32 %v4072_v9, %v4071_v3  ;;  %v692_v41 = vadd.f32 %v4072_v9, %v4071_v3  ;;  %v112_v42 = vmul.f32 %v3334_v37, %v3322_v45 }
  0x44   :  { %2255 = vmatmul.mubr.f32.vlgmr.msra.gmra.mrb[0].mxu1 %v101_v54  ;;  %v693_v25 = vadd.f32 %v3334_v37, %v3322_v45  ;;  %v113_v54 = vmul.f32 %v3354_v63, %v3342_v7  ;;  %v114_v45 = vmul.f32 %v3390_v34, %v3382_v23  ;;  %v695_v37 = vadd.f32 %v3390_v34, %v3382_v23  ;;  %v4075_v23 = vld [vmem:[#allocation6_spill] sm:$0xff]  ;;  %v4076_v34 = vld [vmem:[#allocation7_spill] sm:$0xff] }
  0x45   :  { %2367 = vmatmul.mubr.f32.vlgmr.msra.gmra.mrb[0].mxu0 %v682_v8  ;;  %2257 = vmatprep.mubr.f32.mxu1 %v102_v28  ;;  %v694_v8 = vadd.f32 %v3354_v63, %v3342_v7  ;;  %v2634_v28 = vpack.c.bf16 %v1947_v50, %v1946_v62  ;;  %v4073_v7 = vld [vmem:[#allocation5_spill] sm:$0xff]  ;;  %v4074_v63 = vld [vmem:[#allocation4_spill] sm:$0xff] }
  0x46   :  { %2609 = vmatpush3.bf16.msra.mxu0 %v2606_v27  ;;  %2369 = vmatprep.mubr.f32.mxu0 %v683_v30  ;;  %v2630_v27 = vpack.c.bf16 %v1945_v21, %v1944_v52  ;;  %v115_v30 = vmul.f32 %v3451_v32, %v3446_v31  ;;  %v3677_v52 = vld [vmem:[%s4031_s6] ss:$0 sm:$0xff] }
  0x47   :  { %2611 = vmatprep.subr.bf16.mxu0 %v2610_v20 }
  0x48   :  { %2258 = vmatmul.mubr.f32.gmra.mrb[2].mxu1 %v103_v33  ;;  %v4077_v33 = vld [vmem:[#allocation9_spill] sm:$0xff] }
  0x49   :  { %2370 = vmatmul.mubr.f32.gmra.mrb[2].mxu0 %v684_v1  ;;  %2260 = vmatprep.mubr.f32.mxu1 %v104_v4  ;;  %v1260_v1 = vld [vmem:[%s4029_s4] sm:$0xff]  ;;  %v2809_v4 = vmov 0  }
  0x4a   :  { %2613 = vmatpush3.bf16.msra.mxu0 %v2610_v20  ;;  %2372 = vmatprep.mubr.f32.mxu0 %v685_v40  ;;  %v696_v20 = vadd.f32 %v3451_v32, %v3446_v31  ;;  %v4078_v31 = vld [vmem:[#allocation16_spill] sm:$0xff]  ;;  %v4079_v32 = vld [vmem:[#allocation17_spill] sm:$0xff]  ;;  %v1263_v40 = vld [vmem:[%s4029_s4 + $0x18] sm:$0xff] }
  0x4b   :  { %2615 = vmatprep.subr.bf16.mxu0 %v2614_v46  ;;  %2712 = vset.pattern.permute.xlu1 %v2809_v4 }
  0x4c   :  { %2261 = vmatmul.mubr.f32.gmra.mrb[4].mxu1 %v105_v47  ;;  %2711 = vset.pattern.permute.xlu0 %v2809_v4  ;;  %v1265_v47 = vld [vmem:[%s4029_s4 + $0x28] sm:$0xff] }
  0x4d   :  { %2373 = vmatmul.mubr.f32.gmra.mrb[4].mxu0 %v686_v10  ;;  %2263 = vmatprep.mubr.f32.mxu1 %v106_v13  ;;  %v1266_v10 = vld [vmem:[%s4029_s4 + $0x30] sm:$0xff]  ;;  %v1269_v13 = vld [vmem:[%s4029_s4 + $0x48] sm:$0xff] }
  0x4e   :  { %2617 = vmatpush3.bf16.msra.mxu0 %v2614_v46  ;;  %2375 = vmatprep.mubr.f32.mxu0 %v687_v15  ;;  %v1261_v46 = vld [vmem:[%s4029_s4 + $0x8] sm:$0xff]  ;;  %v1268_v15 = vld [vmem:[%s4029_s4 + $0x40] sm:$0xff] }
  0x4f   :  { %2619 = vmatprep.subr.bf16.mxu0 %v2618_v17  ;;  %1283 = vperm.xlu0 %2711, %v1260_v1  }
  0x50   :  { %2264 = vmatmul.mubr.f32.gmra.mrb[6].mxu1 %v107_v39  ;;  %v1270_v39 = vld [vmem:[%s4029_s4 + $0x50] sm:$0xff] }
  0x51   :  { %2376 = vmatmul.mubr.f32.gmra.mrb[6].mxu0 %v688_v26  ;;  %2266 = vmatprep.mubr.f32.mxu1 %v108_v35  ;;  %v1275_v26 = vld [vmem:[%s4029_s4 + $0x78] sm:$0xff] }
  0x52   :  { %2621 = vmatpush3.bf16.msra.mxu0 %v2618_v17  ;;  %2378 = vmatprep.mubr.f32.mxu0 %v689_v49  ;;  %v1271_v17 = vld [vmem:[%s4029_s4 + $0x58] sm:$0xff] }
  0x53   :  { %2623 = vmatprep.subr.bf16.mxu0 %v2622_v53  ;;  %1288 = vperm.xlu0 %2711, %v1261_v46  }
  0x54   :  { %2267 = vmatmul.mubr.f32.gmra.mrb[8].mxu1 %v109_v18 }
  0x55   :  { %2379 = vmatmul.mubr.f32.gmra.mrb[8].mxu0 %v690_v56  ;;  %2269 = vmatprep.mubr.f32.mxu1 %v110_v14 }
  0x56   :  { %2625 = vmatpush3.bf16.msra.mxu0 %v2622_v53  ;;  %2381 = vmatprep.mubr.f32.mxu0 %v691_v12 }
  0x57   :  { %2627 = vmatprep.subr.bf16.mxu0 %v2626_v2  ;;  %1303 = vperm.xlu0 %2711, %v1264_v11  }
  0x58   :  { %2270 = vmatmul.mubr.f32.gmra.mrb[10].mxu1 %v111_v43 }
  0x59   :  { %2382 = vmatmul.mubr.f32.gmra.mrb[10].mxu0 %v692_v41  ;;  %2272 = vmatprep.mubr.f32.mxu1 %v112_v42 }
  0x5a   :  { %2629 = vmatpush3.bf16.msra.mxu0 %v2626_v2  ;;  %2384 = vmatprep.mubr.f32.mxu0 %v693_v25 }
  0x5b   :  { %2631 = vmatprep.subr.bf16.mxu0 %v2630_v27  ;;  %1313 = vperm.xlu0 %2711, %v1266_v10  }
  0x5c   :  { %2273 = vmatmul.mubr.f32.gmra.mrb[12].mxu1 %v113_v54 }
  0x5d   :  { %2385 = vmatmul.mubr.f32.gmra.mrb[12].mxu0 %v694_v8  ;;  %2275 = vmatprep.mubr.f32.mxu1 %v114_v45 }
  0x5e   :  { %2633 = vmatpush3.bf16.msra.mxu0 %v2630_v27  ;;  %2387 = vmatprep.mubr.f32.mxu0 %v695_v37 }
  0x5f   :  { %2635 = vmatprep.subr.bf16.mxu0 %v2634_v28  ;;  %1323 = vperm.xlu0 %2711, %v1268_v15  }
  0x60   :  { %2276 = vmatmul.mubr.f32.gmra.mrb[14].mxu1 %v115_v30 }
  0x61   :  { %2388 = vmatmul.mubr.f32.gmra.mrb[14].mxu0 %v696_v20 }
  0x62   :  { %2637 = vmatpush3.bf16.msra.mxu0 %v2634_v28  ;;  %2422 = vmatprep.mubr.f32.mxu0 %v4073_v7 }
  0x63   :  { %1333 = vperm.xlu0 %2711, %v1270_v39  }
  0x65   :  { %2423 = vmatmul.mubr.f32.vlgmr.msra.gmra.mrb[0].mxu0 %v4074_v63 }
  0x66   :  { %2425 = vmatprep.mubr.f32.mxu0 %v4075_v23 }
  0x67   :  { %1343 = vperm.xlu0 %2711, %v1272_v22  }
  0x69   :  { %2426 = vmatmul.mubr.f32.gmra.mrb[2].mxu0 %v4076_v34 }
  0x6a   :  { %2428 = vmatprep.mubr.f32.mxu0 %v4077_v33 }
  0x6b   :  { %1353 = vperm.xlu0 %2711, %v1274_v29  }
  0x6d   :  { %2429 = vmatmul.mubr.f32.gmra.mrb[4].mxu0 %v3366_v0  ;;  %v1276_v0 = vld [vmem:[%s4032_s7] sm:$0xff] }
  0x6e   :  { %2431 = vmatprep.mubr.f32.mxu0 %v3374_v58  ;;  %v1277_v58 = vld [vmem:[%s4032_s7 + $0x8] sm:$0xff] }
  0x71   :  { %2432 = vmatmul.mubr.f32.gmra.mrb[6].mxu0 %v3394_v38  ;;  %v2638_v38 = vpack.c.bf16 %v1277_v58, %v1276_v0 }
  0x72   :  { %2434 = vmatprep.mubr.f32.mxu0 %v3398_v24  ;;  %v1278_v24 = vld [vmem:[%s4032_s7 + $0x10] sm:$0xff] }
  0x73   :  { %2639 = vmatprep.subr.bf16.mxu1 %v2638_v38 }
  0x74   :  { %2641 = vmatpush3.bf16.msra.mxu1 %v2638_v38 }
  0x75   :  { %2435 = vmatmul.mubr.f32.gmra.mrb[8].mxu0 %v3402_v51  ;;  %v1279_v51 = vld [vmem:[%s4032_s7 + $0x18] sm:$0xff] }
  0x76   :  { %2437 = vmatprep.mubr.f32.mxu0 %v3415_v60  ;;  %v2642_v60 = vpack.c.bf16 %v1279_v51, %v1278_v24 }
  0x78   :  { %2643 = vmatprep.subr.bf16.mxu1 %v2642_v60 }
  0x79   :  { %2438 = vmatmul.mubr.f32.gmra.mrb[10].mxu0 %v3419_v5  ;;  %2645 = vmatpush3.bf16.msra.mxu1 %v2642_v60  ;;  %v1262_v5 = vld [vmem:[%s4029_s4 + $0x10] sm:$0xff] }
  0x7a   :  { %2440 = vmatprep.mubr.f32.mxu0 %v4078_v31  ;;  %1293 = vperm.xlu1 %2712, %v1262_v5  }
  0x7d   :  { %2441 = vmatmul.mubr.f32.gmra.mrb[12].mxu0 %v4079_v32 }
  0x7e   :  { %2443 = vmatprep.mubr.f32.mxu0 %v4080_v57  ;;  %1298 = vperm.xlu1 %2712, %v1263_v40  }
  0x81   :  { %2444 = vmatmul.mubr.f32.gmra.mrb[14].mxu0 %v4081_v59 }
  0x82   :  { %1308 = vperm.xlu1 %2712, %v1265_v47  }
  0x86   :  { %1318 = vperm.xlu1 %2712, %v1267_v6  }
  0x8a   :  { %1328 = vperm.xlu1 %2712, %v1269_v13  }
  0x8e   :  { %1338 = vperm.xlu1 %2712, %v1271_v17  }
  0x92   :  { %1348 = vperm.xlu1 %2712, %v1273_v16  }
  0x96   :  { %1358 = vperm.xlu1 %2712, %v1275_v26   ;;  %v3729_v26 = vld [vmem:[%s4031_s6 + $0x1] ss:$0 sm:$0xff] }
 0x117   :  { %v2256_v35 = vpop.f32.mrb[0].mxu1 }
 0x118   :  { %v408_v49 = vpop.f32.mrb[1].mxu1 }
 0x11b   :  { %v2259_v53 = vpop.f32.mrb[2].mxu1 }
 0x11c   :  { %v418_v44 = vpop.f32.mrb[3].mxu1 }
 0x11f   :  { %v2262_v36 = vpop.f32.mrb[4].mxu1 }
 0x120   :  { %v428_v18 = vpop.f32.mrb[5].mxu1 }
 0x123   :  { %v2265_v19 = vpop.f32.mrb[6].mxu1 }
 0x124   :  { %v438_v55 = vpop.f32.mrb[7].mxu1 }
 0x127   :  { %v2268_v56 = vpop.f32.mrb[8].mxu1 }
 0x128   :  { %v3660_v61 = vpop.f32.mrb[9].mxu1 }
 0x12b   :  { %v3662_v48 = vpop.f32.mrb[10].mxu1 }
 0x12c   :  { %v3664_v14 = vpop.f32.mrb[11].mxu1 }
 0x12f   :  { %v3666_v12 = vpop.f32.mrb[12].mxu1 }
 0x130   :  { %v3668_v2 = vpop.f32.mrb[13].mxu1 }
 0x133   :  { %v3670_v3 = vpop.f32.mrb[14].mxu1 }
 0x134   :  { %v3672_v9 = vpop.f32.mrb[15].mxu1 }
 0x138   :  { %v2424_v43 = vpop.f32.mrb[0].mxu0 }
 0x139   :  { %v2646_v21 = vadd.f32 %v2424_v43, %v2256_v35  ;;  %v974_v41 = vpop.f32.mrb[1].mxu0 }
 0x13a   :  { %v2647_v42 = vadd.f32 %v974_v41, %v408_v49 }
 0x13b   :  { %v1075_v25 = vadd.f32 %v2646_v21, %v3677_v52 }
 0x13c   :  { %v1074_v27 = vadd.f32 %v2647_v42, %v3677_v52  ;;  %v2427_v54 = vpop.f32.mrb[2].mxu0 }
 0x13d   :  { %v3681_v62 = vmax.f32 %v1075_v25, 0.0  ;;  %v2648_v50 = vadd.f32 %v2427_v54, %v2259_v53  ;;  %v984_v8 = vpop.f32.mrb[3].mxu0 }
 0x13e   :  { %v3683_v45 = vmax.f32 %v1074_v27, 0.0  ;;  %v2649_v37 = vadd.f32 %v984_v8, %v418_v44 }
 0x13f   :  { %2713 = vrsqrt.f32 %v3681_v62  ;;  %v1077_v28 = vadd.f32 %v2648_v50, %v3677_v52  ;;  %vm1115_vm0 = vcmp.eq.f32.partialorder %v3681_v62, inf  ;;  %vm1117_vm1 = vcmp.eq.f32.partialorder %v3681_v62, 0.0 }
 0x140   :  { %2715 = vrsqrt.f32 %v3683_v45  ;;  %v1076_v30 = vadd.f32 %v2649_v37, %v3677_v52  ;;  %v2430_v20 = vpop.f32.mrb[4].mxu0  ;;  %v1118_v38 = vand.u32 2147483648, %v3681_v62  ;;  %vm1108_vm2 = vcmp.eq.f32.partialorder %v3683_v45, inf }
 0x141   :  { %v2650_v7 = vadd.f32 %v2430_v20, %v2262_v36  ;;  %v994_v63 = vpop.f32.mrb[5].mxu0  ;;  %v3689_v23 = vmax.f32 %v1077_v28, 0.0  ;;  %vm1110_vm3 = vcmp.eq.f32.partialorder %v3683_v45, 0.0  ;;  %v1111_v4 = vand.u32 2147483648, %v3683_v45 }
 0x142   :  { %v3691_v34 = vmax.f32 %v1076_v30, 0.0  ;;  %v2651_v33 = vadd.f32 %v994_v63, %v428_v18 }
 0x143   :  { %v1079_v31 = vadd.f32 %v2650_v7, %v3677_v52  ;;  %2717 = vrsqrt.f32 %v3689_v23  ;;  %vm1129_vm6 = vcmp.eq.f32.partialorder %v3689_v23, inf  ;;  %vm1131_vm7 = vcmp.eq.f32.partialorder %v3689_v23, 0.0 }
 0x144   :  { %v1078_v32 = vadd.f32 %v2651_v33, %v3677_v52  ;;  %v2433_v57 = vpop.f32.mrb[6].mxu0  ;;  %2719 = vrsqrt.f32 %v3691_v34  ;;  %v1125_v40 = vand.u32 2147483648, %v3691_v34  ;;  %vm1122_vm5 = vcmp.eq.f32.partialorder %v3691_v34, inf }
 0x145   :  { %v3698_v59 = vmax.f32 %v1079_v31, 0.0  ;;  %v2652_v0 = vadd.f32 %v2433_v57, %v2265_v19  ;;  %v1004_v58 = vpop.f32.mrb[7].mxu0  ;;  %vm1124_vm8 = vcmp.eq.f32.partialorder %v3691_v34, 0.0  ;;  %v1132_v39 = vand.u32 2147483648, %v3689_v23 }
 0x146   :  { %v3702_v24 = vmax.f32 %v1078_v32, 0.0  ;;  %v2653_v51 = vadd.f32 %v1004_v58, %v438_v55 }
 0x147   :  { %2721 = vrsqrt.f32 %v3698_v59  ;;  %v1081_v60 = vadd.f32 %v2652_v0, %v3677_v52  ;;  %v1146_v44 = vand.u32 2147483648, %v3698_v59  ;;  %vm1143_vm11 = vcmp.eq.f32.partialorder %v3698_v59, inf }
 0x148   :  { %2723 = vrsqrt.f32 %v3702_v24  ;;  %v1080_v5 = vadd.f32 %v2653_v51, %v3677_v52  ;;  %v2436_v1 = vpop.f32.mrb[8].mxu0  ;;  %v1139_v29 = vand.u32 2147483648, %v3702_v24  ;;  %vm1136_vm9 = vcmp.eq.f32.partialorder %v3702_v24, inf }
 0x149   :  { %v2714_v46 = vpop.eup %2713  ;;  %v3712_v47 = vmax.f32 %v1081_v60, 0.0  ;;  %v2654_v11 = vadd.f32 %v2436_v1, %v2268_v56  ;;  %v1014_v6 = vpop.f32.mrb[9].mxu0  ;;  %v3747_v56 = vld [vmem:[%s4031_s6 + $0x2] ss:$0 sm:$0xff]  ;;  %vm1138_vm10 = vcmp.eq.f32.partialorder %v3702_v24, 0.0  ;;  %vm1145_vm12 = vcmp.eq.f32.partialorder %v3698_v59, 0.0 }
 0x14a   :  { %v2716_v10 = vpop.eup %2715  ;;  %v1114_v13 = vmul.f32 %v2714_v46, %v3681_v62  ;;  %v3718_v15 = vmax.f32 %v1080_v5, 0.0  ;;  %v2655_v17 = vadd.f32 %v1014_v6, %v3660_v61 }
 0x14b   :  { %2725 = vrsqrt.f32 %v3712_v47  ;;  %v1083_v16 = vadd.f32 %v2654_v11, %v3677_v52  ;;  %v1107_v22 = vmul.f32 %v2716_v10, %v3683_v45  ;;  %vm1157_vm14 = vcmp.eq.f32.partialorder %v3712_v47, inf }
 0x14c   :  { %v1116_v35 = vsel %vm1115_vm0, %v3681_v62, %v1114_v13  ;;  %2727 = vrsqrt.f32 %v3718_v15  ;;  %v1082_v49 = vadd.f32 %v2655_v17, %v3677_v52  ;;  %v2439_v53 = vpop.f32.mrb[10].mxu0  ;;  %vm1150_vm13 = vcmp.eq.f32.partialorder %v3718_v15, inf }
 0x14d   :  { %v3738_v36 = vmax.f32 %v1083_v16, 0.0  ;;  %v2656_v18 = vadd.f32 %v2439_v53, %v3662_v48  ;;  %v1024_v19 = vpop.f32.mrb[11].mxu0  ;;  %v1109_v55 = vsel %vm1108_vm2, %v3683_v45, %v1107_v22  ;;  %v1119_v61 = vsel %vm1117_vm1, %v1118_v38, %v1116_v35  ;;  %v2718_v43 = vpop.eup %2717 }
 0x14e   :  { %v3752_v21 = vmax.f32 %v1082_v49, 0.0  ;;  %v2657_v48 = vadd.f32 %v1024_v19, %v3664_v14  ;;  %v1112_v41 = vsel %vm1110_vm3, %v1111_v4, %v1109_v55  ;;  %v1224_v42 = vmul.f32 %v3729_v26, %v1119_v61  ;;  %v2720_v25 = vpop.eup %2719 }
 0x14f   :  { %2729 = vrsqrt.f32 %v3738_v36  ;;  %v1085_v27 = vadd.f32 %v2656_v18, %v3677_v52  ;;  %v1223_v54 = vmul.f32 %v3729_v26, %v1112_v41  ;;  %v1128_v62 = vmul.f32 %v2718_v43, %v3689_v23 }
 0x150   :  { %2731 = vrsqrt.f32 %v3752_v21  ;;  %v1084_v14 = vadd.f32 %v2657_v48, %v3677_v52  ;;  %v2442_v50 = vpop.f32.mrb[12].mxu0  ;;  %v1245_v8 = vadd.f32 %v3747_v56, %v1224_v42  ;;  %v1121_v45 = vmul.f32 %v2720_v25, %v3691_v34 }
 0x151   :  { %v2722_v37 = vpop.eup %2721  ;;  %v3769_v28 = vmax.f32 %v1085_v27, 0.0  ;;  %v2658_v30 = vadd.f32 %v2442_v50, %v3666_v12  ;;  %v1034_v20 = vpop.f32.mrb[13].mxu0  ;;  %v1244_v7 = vadd.f32 %v3747_v56, %v1223_v54  ;;  %v1130_v63 = vsel %vm1129_vm6, %v3689_v23, %v1128_v62 }
 0x152   :  { %v2724_v33 = vpop.eup %2723  ;;  %v3776_v31 = vmax.f32 %v1084_v14, 0.0  ;;  %v2659_v32 = vadd.f32 %v1034_v20, %v3668_v2  ;;  %v1123_v57 = vsel %vm1122_vm5, %v3691_v34, %v1121_v45  ;;  %v1133_v0 = vsel %vm1131_vm7, %v1132_v39, %v1130_v63 }
 0x153   :  { %v1087_v12 = vadd.f32 %v2658_v30, %v3677_v52  ;;  %2454 = vmatprep.mubr.msk.f32.mxu1 %vm1381_vm4, %v1244_v7  ;;  %v1126_v58 = vsel %vm1124_vm8, %v1125_v40, %v1123_v57  ;;  %v1226_v38 = vmul.f32 %v3729_v26, %v1133_v0  ;;  %v1135_v60 = vmul.f32 %v2724_v33, %v3702_v24 }
 0x154   :  { %2733 = vrsqrt.f32 %v3776_v31  ;;  %v1086_v2 = vadd.f32 %v2659_v32, %v3677_v52  ;;  %v2445_v23 = vpop.f32.mrb[14].mxu0  ;;  %2455 = vmatmul.mubr.msk.f32.vlgmr.msra.gmra.mrb[16].mxu1 %vm1381_vm4, %v1245_v8  ;;  %v1225_v51 = vmul.f32 %v3729_v26, %v1126_v58  ;;  %v1142_v40 = vmul.f32 %v2722_v37, %v3698_v59 }
 0x155   :  { %v2726_v5 = vpop.eup %2725  ;;  %2735 = vrsqrt.f32 %v3769_v28  ;;  %v3799_v34 = vmax.f32 %v1087_v12, 0.0  ;;  %v2660_v1 = vadd.f32 %v2445_v23, %v3670_v3  ;;  %v1044_v4 = vpop.f32.mrb[15].mxu0  ;;  %v1137_v13 = vsel %vm1136_vm9, %v3702_v24, %v1135_v60 }
 0x156   :  { %v2728_v46 = vpop.eup %2727  ;;  %v3803_v11 = vmax.f32 %v1086_v2, 0.0  ;;  %v2661_v6 = vadd.f32 %v1044_v4, %v3672_v9  ;;  %v1246_v10 = vadd.f32 %v3747_v56, %v1225_v51  ;;  %v1247_v39 = vadd.f32 %v3747_v56, %v1226_v38 }
 0x157   :  { %v1089_v17 = vadd.f32 %v2660_v1, %v3677_v52  ;;  %v1140_v3 = vsel %vm1138_vm10, %v1139_v29, %v1137_v13  ;;  %v1144_v16 = vsel %vm1143_vm11, %v3698_v59, %v1142_v40  ;;  %v1153_v55 = vand.u32 2147483648, %v3718_v15 }
 0x158   :  { %2737 = vrsqrt.f32 %v3803_v11  ;;  %v1088_v9 = vadd.f32 %v2661_v6, %v3677_v52  ;;  %2457 = vmatprep.mubr.msk.f32.mxu1 %vm1381_vm4, %v1246_v10  ;;  %v1227_v22 = vmul.f32 %v3729_v26, %v1140_v3  ;;  %v1147_v35 = vsel %vm1145_vm12, %v1146_v44, %v1144_v16 }
 0x159   :  { %v2730_v49 = vpop.eup %2729  ;;  %2739 = vrsqrt.f32 %v3799_v34  ;;  %v3828_v24 = vmax.f32 %v1089_v17, 0.0  ;;  %2458 = vmatmul.mubr.msk.f32.gmra.mrb[18].mxu1 %vm1381_vm4, %v1247_v39  ;;  %v1228_v29 = vmul.f32 %v3729_v26, %v1147_v35  ;;  %v1149_v52 = vmul.f32 %v2728_v46, %v3718_v15 }
 0x15a   :  { %v2732_v53 = vpop.eup %2731  ;;  %v3833_v18 = vmax.f32 %v1088_v9, 0.0  ;;  %v1248_v19 = vadd.f32 %v3747_v56, %v1227_v22  ;;  %v1156_v59 = vmul.f32 %v2726_v5, %v3712_v47  ;;  %vm1152_vm15 = vcmp.eq.f32.partialorder %v3718_v15, 0.0 }
 0x15b   :  { %2741 = vrsqrt.f32 %v3828_v24  ;;  %v1249_v44 = vadd.f32 %v3747_v56, %v1228_v29  ;;  %v1151_v61 = vsel %vm1150_vm13, %v3718_v15, %v1149_v52  ;;  %v1160_v41 = vand.u32 2147483648, %v3712_v47 }
 0x15c   :  { %2743 = vrsqrt.f32 %v3833_v18  ;;  %2460 = vmatprep.mubr.msk.f32.mxu1 %vm1381_vm4, %v1248_v19  ;;  %v1154_v43 = vsel %vm1152_vm15, %v1153_v55, %v1151_v61  ;;  %v1158_v48 = vsel %vm1157_vm14, %v3712_v47, %v1156_v59  ;;  %vm1159_vm0 = vcmp.eq.f32.partialorder %v3712_v47, 0.0 }
 0x15d   :  { %2461 = vmatmul.mubr.msk.f32.gmra.mrb[20].mxu1 %vm1381_vm4, %v1249_v44  ;;  %v1229_v42 = vmul.f32 %v3729_v26, %v1154_v43  ;;  %v1163_v25 = vmul.f32 %v2732_v53, %v3752_v21  ;;  %vm1164_vm1 = vcmp.eq.f32.partialorder %v3752_v21, inf  ;;  %v1161_v27 = vsel %vm1159_vm0, %v1160_v41, %v1158_v48  ;;  %v1294_v48 = vpop.permute.xlu1 %1293  ;;  %v1284_v41 = vpop.permute.xlu0 %1283 }
 0x15e   :  { %v2734_v15 = vpop.eup %2733  ;;  %vm1166_vm2 = vcmp.eq.f32.partialorder %v3752_v21, 0.0  ;;  %v1167_v54 = vand.u32 2147483648, %v3752_v21  ;;  %v1170_v62 = vmul.f32 %v2730_v49, %v3738_v36  ;;  %v1230_v8 = vmul.f32 %v3729_v26, %v1161_v27 }
 0x15f   :  { %v2736_v14 = vpop.eup %2735  ;;  %v1250_v50 = vadd.f32 %v3747_v56, %v1229_v42  ;;  %v1165_v45 = vsel %vm1164_vm1, %v3752_v21, %v1163_v25  ;;  %vm1171_vm3 = vcmp.eq.f32.partialorder %v3738_v36, inf  ;;  %v1174_v30 = vand.u32 2147483648, %v3738_v36 }
 0x160   :  { %v1168_v47 = vsel %vm1166_vm2, %v1167_v54, %v1165_v45  ;;  %v1172_v37 = vsel %vm1171_vm3, %v3738_v36, %v1170_v62  ;;  %v1177_v20 = vmul.f32 %v2734_v15, %v3776_v31  ;;  %v1251_v7 = vadd.f32 %v3747_v56, %v1230_v8 }
 0x161   :  { %2463 = vmatprep.mubr.msk.f32.mxu1 %vm1381_vm4, %v1250_v50  ;;  %v1231_v63 = vmul.f32 %v3729_v26, %v1168_v47  ;;  %vm1173_vm5 = vcmp.eq.f32.partialorder %v3738_v36, 0.0  ;;  %vm1178_vm6 = vcmp.eq.f32.partialorder %v3776_v31, inf  ;;  %v1181_v57 = vand.u32 2147483648, %v3776_v31  ;;  %v1299_v42 = vpop.permute.xlu1 %1298  ;;  %v1289_v25 = vpop.permute.xlu0 %1288 }
 0x162   :  { %v2738_v21 = vpop.eup %2737  ;;  %v1175_v33 = vsel %vm1173_vm5, %v1174_v30, %v1172_v37  ;;  %v1179_v32 = vsel %vm1178_vm6, %v3776_v31, %v1177_v20  ;;  %v1184_v0 = vmul.f32 %v2736_v14, %v3769_v28  ;;  %2464 = vmatmul.mubr.msk.f32.gmra.mrb[22].mxu1 %vm1381_vm4, %v1251_v7  ;;  %vm1180_vm7 = vcmp.eq.f32.partialorder %v3776_v31, 0.0 }
 0x163   :  { %v2740_v12 = vpop.eup %2739  ;;  %v1252_v58 = vadd.f32 %v3747_v56, %v1231_v63  ;;  %v1232_v38 = vmul.f32 %v3729_v26, %v1175_v33  ;;  %vm1185_vm8 = vcmp.eq.f32.partialorder %v3769_v28, inf  ;;  %v1182_v36 = vsel %vm1180_vm7, %v1181_v57, %v1179_v32  ;;  %v3941_v33 = vld [vmem:[%s4033_s8 + $0x2] ss:$0 sm:$0xff] }
 0x164   :  { %v1186_v2 = vsel %vm1185_vm8, %v3769_v28, %v1184_v0  ;;  %v1188_v23 = vand.u32 2147483648, %v3769_v28  ;;  %v1191_v51 = vmul.f32 %v2738_v21, %v3803_v11  ;;  %v1233_v1 = vmul.f32 %v3729_v26, %v1182_v36 }
 0x165   :  { %v2742_v60 = vpop.eup %2741  ;;  %2466 = vmatprep.mubr.msk.f32.mxu1 %vm1381_vm4, %v1252_v58  ;;  %v1253_v5 = vadd.f32 %v3747_v56, %v1232_v38  ;;  %vm1187_vm9 = vcmp.eq.f32.partialorder %v3769_v28, 0.0  ;;  %vm1192_vm10 = vcmp.eq.f32.partialorder %v3803_v11, inf  ;;  %v1195_v46 = vand.u32 2147483648, %v3803_v11  ;;  %v1309_v15 = vpop.permute.xlu1 %1308 }
 0x166   :  { %v2744_v31 = vpop.eup %2743  ;;  %v1189_v4 = vsel %vm1187_vm9, %v1188_v23, %v1186_v2  ;;  %v1193_v40 = vsel %vm1192_vm10, %v3803_v11, %v1191_v51  ;;  %v1198_v6 = vmul.f32 %v2740_v12, %v3799_v34  ;;  %v1254_v10 = vadd.f32 %v3747_v56, %v1233_v1  ;;  %v1304_v54 = vpop.permute.xlu0 %1303 }
 0x167   :  { %2467 = vmatmul.mubr.msk.f32.gmra.mrb[24].mxu1 %vm1381_vm4, %v1253_v5  ;;  %v1234_v13 = vmul.f32 %v3729_v26, %v1189_v4  ;;  %vm1194_vm11 = vcmp.eq.f32.partialorder %v3803_v11, 0.0  ;;  %vm1199_vm12 = vcmp.eq.f32.partialorder %v3799_v34, inf  ;;  %v1202_v39 = vand.u32 2147483648, %v3799_v34 }
 0x168   :  { %v1196_v28 = vsel %vm1194_vm11, %v1195_v46, %v1193_v40  ;;  %v1200_v17 = vsel %vm1199_vm12, %v3799_v34, %v1198_v6  ;;  %v1205_v3 = vmul.f32 %v2744_v31, %v3833_v18  ;;  %2469 = vmatprep.mubr.msk.f32.mxu1 %vm1381_vm4, %v1254_v10  ;;  %vm1201_vm13 = vcmp.eq.f32.partialorder %v3799_v34, 0.0 }
 0x169   :  { %v1255_v16 = vadd.f32 %v3747_v56, %v1234_v13  ;;  %v1235_v9 = vmul.f32 %v3729_v26, %v1196_v28  ;;  %vm1206_vm14 = vcmp.eq.f32.partialorder %v3833_v18, inf  ;;  %v1203_v11 = vsel %vm1201_vm13, %v1202_v39, %v1200_v17  ;;  %v1319_v8 = vpop.permute.xlu1 %1318 }
 0x16a   :  { %v1207_v22 = vsel %vm1206_vm14, %v3833_v18, %v1205_v3  ;;  %v1209_v35 = vand.u32 2147483648, %v3833_v18  ;;  %v1212_v49 = vmul.f32 %v2742_v60, %v3828_v24  ;;  %v1236_v52 = vmul.f32 %v3729_v26, %v1203_v11  ;;  %v1314_v47 = vpop.permute.xlu0 %1313 }
 0x16b   :  { %2470 = vmatmul.mubr.msk.f32.gmra.mrb[26].mxu1 %vm1381_vm4, %v1255_v16  ;;  %v1256_v29 = vadd.f32 %v3747_v56, %v1235_v9  ;;  %vm1208_vm15 = vcmp.eq.f32.partialorder %v3833_v18, 0.0  ;;  %vm1213_vm0 = vcmp.eq.f32.partialorder %v3828_v24, inf  ;;  %v1216_v19 = vand.u32 2147483648, %v3828_v24 }
 0x16c   :  { %v1210_v34 = vsel %vm1208_vm15, %v1209_v35, %v1207_v22  ;;  %v1214_v53 = vsel %vm1213_vm0, %v3828_v24, %v1212_v49  ;;  %v1257_v55 = vadd.f32 %v3747_v56, %v1236_v52  ;;  %vm1215_vm1 = vcmp.eq.f32.partialorder %v3828_v24, 0.0  ;;  %v3925_v24 = vld [vmem:[%s4033_s8] ss:$0 sm:$0xff] }
 0x16d   :  { %2472 = vmatprep.mubr.msk.f32.mxu1 %vm1381_vm4, %v1256_v29  ;;  %v1237_v59 = vmul.f32 %v3729_v26, %v1210_v34  ;;  %v1217_v44 = vsel %vm1215_vm1, %v1216_v19, %v1214_v53  ;;  %v1366_v27 = vmul.f32 %v3925_v24, %v1289_v25  ;;  %v1368_v30 = vmul.f32 %v3925_v24, %v1299_v42  ;;  %v1329_v36 = vpop.permute.xlu1 %1328 }
 0x16e   :  { %v1238_v61 = vmul.f32 %v3729_v26, %v1217_v44  ;;  %v1365_v26 = vmul.f32 %v3925_v24, %v1284_v41  ;;  %v1367_v7 = vmul.f32 %v3925_v24, %v1294_v48  ;;  %vm1665_vm3 = vcmask 523264   ;;  %v1324_v5 = vpop.permute.xlu0 %1323 }
 0x16f   :  { %2473 = vmatmul.mubr.msk.f32.gmra.mrb[28].mxu1 %vm1381_vm4, %v1257_v55  ;;  %v1258_v18 = vadd.f32 %v3747_v56, %v1237_v59  ;;  %v1370_v38 = vmul.f32 %v3925_v24, %v1309_v15  ;;  %v1369_v60 = vmul.f32 %v3925_v24, %v1304_v54  ;;  %v1372_v22 = vmul.f32 %v3925_v24, %v1319_v8 }
 0x170   :  { %v1259_v43 = vadd.f32 %v3747_v56, %v1238_v61  ;;  %v3932_v56 = vld [vmem:[%s4033_s8 + $0x1] ss:$0 sm:$0xff]  ;;  %v1371_v35 = vmul.f32 %v3925_v24, %v1314_v47  ;;  %v1374_v48 = vmul.f32 %v3925_v24, %v1329_v36  ;;  %v1373_v25 = vmul.f32 %v3925_v24, %v1324_v5 }
 0x171   :  { %2475 = vmatprep.mubr.msk.f32.mxu1 %vm1381_vm4, %v1258_v18  ;;  %v1339_v49 = vpop.permute.xlu1 %1338 }
 0x172   :  { %v1334_v52 = vpop.permute.xlu0 %1333 }
 0x173   :  { %2476 = vmatmul.mubr.msk.f32.gmra.mrb[30].mxu1 %vm1381_vm4, %v1259_v43 }
 0x176   :  { %v1344_v47 = vpop.permute.xlu0 %1343 }
 0x227   :  { %v2456_v62 = vpop.f32.mrb[16].mxu1 }
 0x228   :  { %v1502_v14 = vadd.f32 %v2456_v62, %v1366_v27  ;;  %v1496_v50 = vpop.f32.mrb[17].mxu1  ;;  %v1349_v62 = vpop.permute.xlu1 %1348 }
 0x229   :  { %v1497_v45 = vadd.f32 %v1496_v50, %v1365_v26 }
 0x22a   :  { %v1581_v37 = vadd.f32 %v3932_v56, %v1502_v14 }
 0x22b   :  { %v1580_v20 = vadd.f32 %v3932_v56, %v1497_v45 }
 0x22c   :  { %v1613_v63 = vmul.f32 0.1, %v1581_v37  ;;  %v2459_v21 = vpop.f32.mrb[18].mxu1  ;;  %vm1597_vm4 = vcmp.gt.f32.partialorder %v1581_v37, 0.0 }
 0x22d   :  { %v1612_v32 = vmul.f32 0.1, %v1580_v20  ;;  %v1512_v57 = vadd.f32 %v2459_v21, %v1368_v30  ;;  %v1506_v0 = vpop.f32.mrb[19].mxu1  ;;  %vm1596_vm2 = vcmp.gt.f32.partialorder %v1580_v20, 0.0 }
 0x22e   :  { %v1507_v12 = vadd.f32 %v1506_v0, %v1367_v7  ;;  %v1629_v58 = vsel %vm1597_vm4, %v1581_v37, %v1613_v63  ;;  %v1375_v7 = vmul.f32 %v3925_v24, %v1334_v52 }
 0x22f   :  { %v1583_v2 = vadd.f32 %v3932_v56, %v1512_v57  ;;  %v1650_v23 = vmul.f32 %v3941_v33, %v1629_v58  ;;  %v1628_v51 = vsel %vm1596_vm2, %v1580_v20, %v1612_v32  ;;  %v1376_v20 = vmul.f32 %v3925_v24, %v1339_v49 }
 0x230   :  { %v1582_v1 = vadd.f32 %v3932_v56, %v1507_v12  ;;  %v2462_v31 = vpop.f32.mrb[20].mxu1  ;;  %v1649_v4 = vmul.f32 %v3941_v33, %v1628_v51  ;;  %v1378_v51 = vmul.f32 %v3925_v24, %v1349_v62  ;;  %vm1828_vm2 = vcmask 7168  }
 0x231   :  { %v1615_v40 = vmul.f32 0.1, %v1583_v2  ;;  %v1522_v46 = vadd.f32 %v2462_v31, %v1370_v38  ;;  %v1516_v6 = vpop.f32.mrb[21].mxu1  ;;  %v1669_v10 = vsel %vm1665_vm3, %v1650_v23, 0.0  ;;  %vm1599_vm5 = vcmp.gt.f32.partialorder %v1583_v2, 0.0  ;;  %v1359_v31 = vpop.permute.xlu1 %1358 }
 0x232   :  { %v1614_v13 = vmul.f32 0.1, %v1582_v1  ;;  %v1517_v28 = vadd.f32 %v1516_v6, %v1369_v60  ;;  %1670 = vadd.xlane.f32.xlu1 %v1669_v10  ;;  %v1666_v17 = vsel %vm1665_vm3, %v1649_v4, 0.0  ;;  %vm1598_vm6 = vcmp.gt.f32.partialorder %v1582_v1, 0.0  ;;  %v1354_v6 = vpop.permute.xlu0 %1353 }
 0x233   :  { %v1585_v39 = vadd.f32 %v3932_v56, %v1522_v46  ;;  %1667 = vadd.xlane.f32.xlu0 %v1666_v17  ;;  %v1631_v3 = vsel %vm1599_vm5, %v1583_v2, %v1615_v40 }
 0x234   :  { %v1584_v16 = vadd.f32 %v3932_v56, %v1517_v28  ;;  %v1652_v9 = vmul.f32 %v3941_v33, %v1631_v3  ;;  %v1630_v11 = vsel %vm1598_vm6, %v1582_v1, %v1614_v13  ;;  %v1377_v1 = vmul.f32 %v3925_v24, %v1344_v47 }
 0x235   :  { %v1617_v29 = vmul.f32 0.1, %v1585_v39  ;;  %vm1601_vm7 = vcmp.gt.f32.partialorder %v1585_v39, 0.0  ;;  %v2465_v53 = vpop.f32.mrb[22].mxu1  ;;  %v1651_v55 = vmul.f32 %v3941_v33, %v1630_v11 }
 0x236   :  { %v1616_v34 = vmul.f32 0.1, %v1584_v16  ;;  %v1675_v19 = vsel %vm1665_vm3, %v1652_v9, 0.0  ;;  %vm1600_vm8 = vcmp.gt.f32.partialorder %v1584_v16, 0.0  ;;  %v1532_v59 = vadd.f32 %v2465_v53, %v1372_v22  ;;  %v1526_v44 = vpop.f32.mrb[23].mxu1 }
 0x237   :  { %1676 = vadd.xlane.f32.xlu0 %v1675_v19  ;;  %v1633_v18 = vsel %vm1601_vm7, %v1585_v39, %v1617_v29  ;;  %v1527_v61 = vadd.f32 %v1526_v44, %v1371_v35  ;;  %v1672_v54 = vsel %vm1665_vm3, %v1651_v55, 0.0  ;;  %v1380_v22 = vmul.f32 %v3925_v24, %v1359_v31 }
 0x238   :  { %v1632_v43 = vsel %vm1600_vm8, %v1584_v16, %v1616_v34  ;;  %v1587_v41 = vadd.f32 %v3932_v56, %v1532_v59  ;;  %v1654_v26 = vmul.f32 %v3941_v33, %v1633_v18  ;;  %v1379_v29 = vmul.f32 %v3925_v24, %v1354_v6 }
 0x239   :  { %v1653_v42 = vmul.f32 %v3941_v33, %v1632_v43  ;;  %v1586_v15 = vadd.f32 %v3932_v56, %v1527_v61 }
 0x23a   :  { %v2468_v27 = vpop.f32.mrb[24].mxu1  ;;  %v1619_v14 = vmul.f32 0.1, %v1587_v41  ;;  %vm1603_vm9 = vcmp.gt.f32.partialorder %v1587_v41, 0.0  ;;  %v1681_v12 = vsel %vm1665_vm3, %v1654_v26, 0.0 }
 0x23b   :  { %v1542_v50 = vadd.f32 %v2468_v27, %v1374_v48  ;;  %v1536_v8 = vpop.f32.mrb[25].mxu1  ;;  %v1678_v45 = vsel %vm1665_vm3, %v1653_v42, 0.0  ;;  %1673 = vadd.xlane.f32.xlu0 %v1672_v54  ;;  %v1618_v37 = vmul.f32 0.1, %v1586_v15  ;;  %vm1602_vm10 = vcmp.gt.f32.partialorder %v1586_v15, 0.0 }
 0x23c   :  { %v1537_v30 = vadd.f32 %v1536_v8, %v1373_v25  ;;  %1679 = vadd.xlane.f32.xlu1 %v1678_v45  ;;  %v1635_v21 = vsel %vm1603_vm9, %v1587_v41, %v1619_v14 }
 0x23d   :  { %v1589_v63 = vadd.f32 %v3932_v56, %v1542_v50  ;;  %v1634_v0 = vsel %vm1602_vm10, %v1586_v15, %v1618_v37  ;;  %v1656_v58 = vmul.f32 %v3941_v33, %v1635_v21 }
 0x23e   :  { %v1588_v32 = vadd.f32 %v3932_v56, %v1537_v30  ;;  %v2471_v57 = vpop.f32.mrb[26].mxu1  ;;  %v1655_v23 = vmul.f32 %v3941_v33, %v1634_v0 }
 0x23f   :  { %v1621_v38 = vmul.f32 0.1, %v1589_v63  ;;  %v1552_v36 = vadd.f32 %v2471_v57, %v1376_v20  ;;  %v1546_v2 = vpop.f32.mrb[27].mxu1  ;;  %1682 = vadd.xlane.f32.xlu0 %v1681_v12  ;;  %vm1605_vm11 = vcmp.gt.f32.partialorder %v1589_v63, 0.0  ;;  %v1687_v17 = vsel %vm1665_vm3, %v1656_v58, 0.0 }
 0x240   :  { %v1620_v60 = vmul.f32 0.1, %v1588_v32  ;;  %v1547_v5 = vadd.f32 %v1546_v2, %v1375_v7  ;;  %vm1604_vm12 = vcmp.gt.f32.partialorder %v1588_v32, 0.0  ;;  %v1684_v40 = vsel %vm1665_vm3, %v1655_v23, 0.0 }
 0x241   :  { %v1591_v4 = vadd.f32 %v3932_v56, %v1552_v36  ;;  %v1637_v46 = vsel %vm1605_vm11, %v1589_v63, %v1621_v38  ;;  %1685 = vadd.xlane.f32.xlu1 %v1684_v40 }
 0x242   :  { %v1590_v10 = vadd.f32 %v3932_v56, %v1547_v5  ;;  %v2474_v13 = vpop.f32.mrb[28].mxu1  ;;  %v1636_v28 = vsel %vm1604_vm12, %v1588_v32, %v1620_v60  ;;  %v1658_v39 = vmul.f32 %v3941_v33, %v1637_v46  ;;  %v4004_v32 = vstv %s4034_s9 }
 0x243   :  { %v1623_v3 = vmul.f32 0.1, %v1591_v4  ;;  %v1562_v16 = vadd.f32 %v2474_v13, %v1378_v51  ;;  %v1556_v9 = vpop.f32.mrb[29].mxu1  ;;  %v1657_v11 = vmul.f32 %v3941_v33, %v1636_v28  ;;  %1688 = vadd.xlane.f32.xlu0 %v1687_v17  ;;  %vm1607_vm13 = vcmp.gt.f32.partialorder %v1591_v4, 0.0 }
 0x244   :  { %v1622_v35 = vmul.f32 0.1, %v1590_v10  ;;  %v1557_v49 = vadd.f32 %v1556_v9, %v1377_v1  ;;  %vm1606_vm14 = vcmp.gt.f32.partialorder %v1590_v10, 0.0  ;;  %v1693_v44 = vsel %vm1665_vm3, %v1658_v39, 0.0 }
 0x245   :  { %v1593_v52 = vadd.f32 %v3932_v56, %v1562_v16  ;;  %v1690_v34 = vsel %vm1665_vm3, %v1657_v11, 0.0  ;;  %v1639_v53 = vsel %vm1607_vm13, %v1591_v4, %v1623_v3 }
 0x246   :  { %v1592_v19 = vadd.f32 %v3932_v56, %v1557_v49  ;;  %1691 = vadd.xlane.f32.xlu1 %v1690_v34  ;;  %v2477_v55 = vpop.f32.mrb[30].mxu1  ;;  %v1638_v59 = vsel %vm1606_vm14, %v1590_v10, %v1622_v35  ;;  %v1660_v18 = vmul.f32 %v3941_v33, %v1639_v53 }
 0x247   :  { %v1625_v61 = vmul.f32 0.1, %v1593_v52  ;;  %v1572_v43 = vadd.f32 %v2477_v55, %v1380_v22  ;;  %v1566_v48 = vpop.f32.mrb[31].mxu1  ;;  %v1659_v41 = vmul.f32 %v3941_v33, %v1638_v59  ;;  %1694 = vadd.xlane.f32.xlu0 %v1693_v44  ;;  %vm1609_vm15 = vcmp.gt.f32.partialorder %v1593_v52, 0.0 }
 0x248   :  { %v1624_v24 = vmul.f32 0.1, %v1592_v19  ;;  %v1567_v42 = vadd.f32 %v1566_v48, %v1379_v29  ;;  %vm1608_vm0 = vcmp.gt.f32.partialorder %v1592_v19, 0.0  ;;  %v1699_v62 = vsel %vm1665_vm3, %v1660_v18, 0.0 }
 0x249   :  { %v1595_v25 = vadd.f32 %v3932_v56, %v1572_v43  ;;  %v1696_v15 = vsel %vm1665_vm3, %v1659_v41, 0.0  ;;  %v1641_v27 = vsel %vm1609_vm15, %v1593_v52, %v1625_v61 }
 0x24a   :  { %v1594_v54 = vadd.f32 %v3932_v56, %v1567_v42  ;;  %1697 = vadd.xlane.f32.xlu1 %v1696_v15  ;;  %v1640_v26 = vsel %vm1608_vm0, %v1592_v19, %v1624_v24  ;;  %v1662_v14 = vmul.f32 %v3941_v33, %v1641_v27 }
 0x24b   :  { %v1627_v50 = vmul.f32 0.1, %v1595_v25  ;;  %v1661_v8 = vmul.f32 %v3941_v33, %v1640_v26  ;;  %1700 = vadd.xlane.f32.xlu0 %v1699_v62  ;;  %vm1611_vm1 = vcmp.gt.f32.partialorder %v1595_v25, 0.0 }
 0x24c   :  { %v1626_v45 = vmul.f32 0.1, %v1594_v54  ;;  %vm1610_vm4 = vcmp.gt.f32.partialorder %v1594_v54, 0.0  ;;  %v1705_v30 = vsel %vm1665_vm3, %v1662_v14, 0.0 }
 0x24d   :  { %v1702_v47 = vsel %vm1665_vm3, %v1661_v8, 0.0  ;;  %v1643_v37 = vsel %vm1611_vm1, %v1595_v25, %v1627_v50 }
 0x24e   :  { %1703 = vadd.xlane.f32.xlu1 %v1702_v47  ;;  %v1642_v56 = vsel %vm1610_vm4, %v1594_v54, %v1626_v45  ;;  %v1664_v20 = vmul.f32 %v3941_v33, %v1643_v37 }
 0x24f   :  { %1706 = vadd.xlane.f32.xlu0 %v1705_v30  ;;  %v1663_v7 = vmul.f32 %v3941_v33, %v1642_v56 }
 0x250   :  { %v1711_v21 = vsel %vm1665_vm3, %v1664_v20, 0.0 }
 0x251   :  { %v1708_v63 = vsel %vm1665_vm3, %v1663_v7, 0.0 }
 0x252   :  { %1709 = vadd.xlane.f32.xlu1 %v1708_v63 }
 0x253   :  { %1712 = vadd.xlane.f32.xlu0 %v1711_v21 }
 0x2bf   :  { %v1671_v57 = vpop.xlane.xlu1 %1670 }
 0x2c0   :  { %v1717_v0 = vadd.f32 %v4004_v32, %v1671_v57  ;;  %v1668_v12 = vpop.xlane.xlu0 %1667 }
 0x2c1   :  { %v1716_v58 = vadd.f32 %v4004_v32, %v1668_v12 }
 0x2c2   :  { %v1971_v38 = vmul.f32 -1.442695, %v1717_v0 }
 0x2c3   :  { %v1970_v36 = vmul.f32 -1.442695, %v1716_v58 }
 0x2c4   :  { %2745 = vpow2.f32 %v1971_v38  ;;  %v1677_v33 = vpop.xlane.xlu0 %1676 }
 0x2c5   :  { %2747 = vpow2.f32 %v1970_v36  ;;  %v1719_v2 = vadd.f32 %v4004_v32, %v1677_v33 }
 0x2c7   :  { %v1973_v23 = vmul.f32 -1.442695, %v1719_v2 }
 0x2c8   :  { %v1674_v51 = vpop.xlane.xlu0 %1673 }
 0x2c9   :  { %2749 = vpow2.f32 %v1973_v23  ;;  %v1680_v60 = vpop.xlane.xlu1 %1679  ;;  %v1718_v5 = vadd.f32 %v4004_v32, %v1674_v51 }
 0x2ca   :  { %v1720_v1 = vadd.f32 %v4004_v32, %v1680_v60 }
 0x2cb   :  { %v1972_v31 = vmul.f32 -1.442695, %v1718_v5 }
 0x2cc   :  { %v1974_v4 = vmul.f32 -1.442695, %v1720_v1  ;;  %v1683_v40 = vpop.xlane.xlu0 %1682 }
 0x2cd   :  { %2751 = vpow2.f32 %v1972_v31  ;;  %v1721_v46 = vadd.f32 %v4004_v32, %v1683_v40 }
 0x2ce   :  { %v2746_v6 = vpop.eup %2745  ;;  %2753 = vpow2.f32 %v1974_v4  ;;  %v1686_v28 = vpop.xlane.xlu1 %1685 }
 0x2cf   :  { %v2748_v10 = vpop.eup %2747  ;;  %v1781_v13 = vadd.f32 1.0, %v2746_v6  ;;  %v1975_v17 = vmul.f32 -1.442695, %v1721_v46  ;;  %v1722_v3 = vadd.f32 %v4004_v32, %v1686_v28 }
 0x2d0   :  { %v1780_v39 = vadd.f32 1.0, %v2748_v10  ;;  %v1689_v16 = vpop.xlane.xlu0 %1688 }
 0x2d1   :  { %2755 = vrcp.f32 %v1781_v13  ;;  %v1723_v9 = vadd.f32 %v4004_v32, %v1689_v16  ;;  %v1976_v11 = vmul.f32 -1.442695, %v1722_v3 }
 0x2d2   :  { %2757 = vrcp.f32 %v1780_v39 }
 0x2d3   :  { %v2750_v22 = vpop.eup %2749  ;;  %2759 = vpow2.f32 %v1975_v17  ;;  %v1692_v35 = vpop.xlane.xlu1 %1691  ;;  %v1977_v49 = vmul.f32 -1.442695, %v1723_v9 }
 0x2d4   :  { %v1783_v29 = vadd.f32 1.0, %v2750_v22  ;;  %2761 = vpow2.f32 %v1976_v11  ;;  %v1724_v52 = vadd.f32 %v4004_v32, %v1692_v35  ;;  %v1695_v34 = vpop.xlane.xlu0 %1694 }
 0x2d5   :  { %2763 = vpow2.f32 %v1977_v49  ;;  %v1725_v53 = vadd.f32 %v4004_v32, %v1695_v34 }
 0x2d6   :  { %2765 = vrcp.f32 %v1783_v29  ;;  %v1978_v19 = vmul.f32 -1.442695, %v1724_v52 }
 0x2d7   :  { %v2752_v55 = vpop.eup %2751  ;;  %v1698_v59 = vpop.xlane.xlu1 %1697  ;;  %v1979_v44 = vmul.f32 -1.442695, %v1725_v53 }
 0x2d8   :  { %v2754_v18 = vpop.eup %2753  ;;  %v1782_v61 = vadd.f32 1.0, %v2752_v55  ;;  %2767 = vpow2.f32 %v1978_v19  ;;  %v1726_v43 = vadd.f32 %v4004_v32, %v1698_v59  ;;  %v1701_v48 = vpop.xlane.xlu0 %1700 }
 0x2d9   :  { %v1784_v41 = vadd.f32 1.0, %v2754_v18  ;;  %2769 = vpow2.f32 %v1979_v44  ;;  %v1727_v24 = vadd.f32 %v4004_v32, %v1701_v48 }
 0x2da   :  { %2771 = vrcp.f32 %v1782_v61  ;;  %v1980_v42 = vmul.f32 -1.442695, %v1726_v43 }
 0x2db   :  { %v2756_v25 = vpop.eup %2755  ;;  %2773 = vrcp.f32 %v1784_v41  ;;  %v1704_v15 = vpop.xlane.xlu1 %1703  ;;  %v1981_v27 = vmul.f32 -1.442695, %v1727_v24 }
 0x2dc   :  { %v2758_v54 = vpop.eup %2757  ;;  %2775 = vpow2.f32 %v1980_v42  ;;  %v1728_v26 = vadd.f32 %v4004_v32, %v1704_v15  ;;  %v1707_v62 = vpop.xlane.xlu0 %1706 }
 0x2dd   :  { %v2760_v14 = vpop.eup %2759  ;;  %1829 = vst.msk [vmem:[#allocation3] sm:$0xff] %vm1828_vm2, %v2758_v54  ;;  %2777 = vpow2.f32 %v1981_v27  ;;  %v1729_v50 = vadd.f32 %v4004_v32, %v1707_v62 }
 0x2de   :  { %v2762_v8 = vpop.eup %2761  ;;  %v1785_v45 = vadd.f32 1.0, %v2760_v14  ;;  %v1982_v30 = vmul.f32 -1.442695, %v1728_v26 }
 0x2df   :  { %v2764_v47 = vpop.eup %2763  ;;  %v1786_v37 = vadd.f32 1.0, %v2762_v8  ;;  %v1710_v56 = vpop.xlane.xlu1 %1709  ;;  %v1983_v63 = vmul.f32 -1.442695, %v1729_v50 }
 0x2e0   :  { %v2766_v20 = vpop.eup %2765  ;;  %2779 = vrcp.f32 %v1785_v45  ;;  %v1787_v7 = vadd.f32 1.0, %v2764_v47  ;;  %v1730_v21 = vadd.f32 %v4004_v32, %v1710_v56  ;;  %v1713_v57 = vpop.xlane.xlu0 %1712 }
 0x2e1   :  { %2781 = vrcp.f32 %v1786_v37  ;;  %v1731_v0 = vadd.f32 %v4004_v32, %v1713_v57 }
 0x2e2   :  { %v2768_v12 = vpop.eup %2767  ;;  %2783 = vrcp.f32 %v1787_v7  ;;  %v1984_v36 = vmul.f32 -1.442695, %v1730_v21 }
 0x2e3   :  { %v2770_v58 = vpop.eup %2769  ;;  %v1788_v38 = vadd.f32 1.0, %v2768_v12  ;;  %2785 = vpow2.f32 %v1982_v30  ;;  %v1985_v51 = vmul.f32 -1.442695, %v1731_v0 }
 0x2e4   :  { %v2772_v33 = vpop.eup %2771  ;;  %v1862_v2 = vld [vmem:[#allocation3] sm:$0x3]  ;;  %v1789_v23 = vadd.f32 1.0, %v2770_v58  ;;  %2787 = vpow2.f32 %v1983_v63 }
 0x2e5   :  { %v2774_v60 = vpop.eup %2773  ;;  %1863 = vst [vmem:[%s4035_s10] sm:$0x3] %v1862_v2  ;;  %2789 = vrcp.f32 %v1788_v38 }
 0x2e6   :  { %v2776_v5 = vpop.eup %2775  ;;  %2791 = vrcp.f32 %v1789_v23 }
 0x2e7   :  { %v2778_v32 = vpop.eup %2777  ;;  %v1790_v1 = vadd.f32 1.0, %v2776_v5  ;;  %2793 = vpow2.f32 %v1984_v36 }
 0x2e8   :  { %v1791_v31 = vadd.f32 1.0, %v2778_v32  ;;  %2795 = vpow2.f32 %v1985_v51 }
 0x2e9   :  { %2797 = vrcp.f32 %v1790_v1 }
 0x2ea   :  { %v2780_v4 = vpop.eup %2779  ;;  %2799 = vrcp.f32 %v1791_v31 }
 0x2eb   :  { %v2782_v40 = vpop.eup %2781 }
 0x2ec   :  { %v2784_v46 = vpop.eup %2783 }
 0x2ed   :  { %v2786_v6 = vpop.eup %2785 }
 0x2ee   :  { %v2788_v10 = vpop.eup %2787  ;;  %v1792_v13 = vadd.f32 1.0, %v2786_v6 }
 0x2ef   :  { %v2790_v28 = vpop.eup %2789  ;;  %v1793_v17 = vadd.f32 1.0, %v2788_v10 }
 0x2f0   :  { %v2792_v39 = vpop.eup %2791  ;;  %2801 = vrcp.f32 %v1792_v13 }
 0x2f1   :  { %v2794_v3 = vpop.eup %2793  ;;  %2803 = vrcp.f32 %v1793_v17 }
 0x2f2   :  { %v2796_v16 = vpop.eup %2795  ;;  %v1794_v9 = vadd.f32 1.0, %v2794_v3 }
 0x2f3   :  { %v2798_v11 = vpop.eup %2797  ;;  %v1795_v22 = vadd.f32 1.0, %v2796_v16 }
 0x2f4   :  { %v2800_v35 = vpop.eup %2799  ;;  %2805 = vrcp.f32 %v1794_v9 }
 0x2f5   :  { %2807 = vrcp.f32 %v1795_v22 }
 0x2fa   :  { %v2802_v49 = vpop.eup %2801 }
 0x2fb   :  { %v2804_v29 = vpop.eup %2803 }
 0x2fe   :  { %v2806_v52 = vpop.eup %2805 }
 0x2ff   :  { %v2808_v34 = vpop.eup %2807 }

</bundles_post_ra>
